<compile_context>
chip_gen: v7x
topology: tpu7x:2x2x1
jax: 0.10.0
libtpu: 0.0.40
codegen_flags: <defaults>
</compile_context>

<pallas_src>
import functools
import math

import jax
import jax.numpy as jnp
from jax.experimental import pallas as pl
from jax.experimental.pallas import tpu as pltpu  # noqa: F401  (kept for TODOs above)


# ----------------------------- kernel helpers -----------------------------

def _layer_norm(x, w, b, eps=1e-5):
    # Single-pass statistics: E[x] and E[x^2] are independent reductions.
    mu = jnp.mean(x, axis=-1, keepdims=True)
    ms = jnp.mean(x * x, axis=-1, keepdims=True)
    var = ms - mu * mu
    return (x - mu) * jax.lax.rsqrt(var + eps) * w + b


# ------------------------------- the kernel -------------------------------

def decoder_layer_kernel(
    # activations (batch folded into rows)
    x_ref, mem_ref,
    # self-attention block
    ln1w_ref, ln1b_ref,
    wq1_ref, wk1_ref, wv1_ref, bq1_ref, bk1_ref, bv1_ref, wo1_ref, bo1_ref,
    # cross-attention block
    ln2w_ref, ln2b_ref,
    wq2_ref, bq2_ref, wk2_ref, wv2_ref, bk2_ref, bv2_ref, wo2_ref, bo2_ref,
    # feed-forward block
    ln3w_ref, ln3b_ref, wi_ref, bi_ref, wof_ref, bof_ref,
    # output (lane-dense slab)
    out_ref,
    *, batch, tgt_len, src_len, heads, approx_softmax,
):
    B, T, S, H = batch, tgt_len, src_len, heads
    E = x_ref.shape[-1]
    D = E // H
    bf16 = jnp.bfloat16
    scale = 1.0 / math.sqrt(D)

    x = x_ref[...]        # (B*T, E) f32 residual stream
    mem = mem_ref[...]    # (B*S, E) f32

    def dot(a_bf16, w_ref, b_ref):
        # bf16 operands on the MXU, f32 accumulation, f32 bias add.
        return jnp.dot(a_bf16, w_ref[...],
                       preferred_element_type=jnp.float32) + b_ref[...]

    def to_heads(a2d, rows):
        # (B*rows, H*D) f32 -> (H*B, rows, D) bf16, g = h*B + b.
        # Lane slices + leading-dim reshape + leading-axis concat only
        # (portable Mosaic ops); see TODO(synk) in the header.
        parts = [a2d[:, h * D:(h + 1) * D].reshape(B, rows, D)
                 for h in range(H)]
        return jnp.concatenate(parts, axis=0).astype(bf16)

    def from_heads(o3):
        # combine_heads: (H*B, T, D) f32 -> (B*T, H*D) f32 via a single
        # lane-axis concat (one in-vreg relayout; H*D = E < 128 lanes).
        cols = [o3[h * B:(h + 1) * B].reshape(B * T, D) for h in range(H)]
        return jnp.concatenate(cols, axis=-1)

    def attention(q2d, k2d, v2d, kv_rows, wo_ref, bo_ref):
        # q2d: (B*T, E) f32, k2d/v2d: (B*kv_rows, E) f32.
        q = to_heads(q2d, T)          # (G, T, D)
        k = to_heads(k2d, kv_rows)    # (G, S, D)
        v = to_heads(v2d, kv_rows)    # (G, S, D)
        s = jnp.einsum("gtd,gsd->gts", q, k,
                       preferred_element_type=jnp.float32) * scale
        s = s - jnp.max(s, axis=-1, keepdims=True)
        p = jnp.exp(s)
        denom = jnp.sum(p, axis=-1, keepdims=True)
        if approx_softmax:
            # EUP reciprocal: otherwise-idle slot, ~1e-3 relative error.
            p = p * pl.reciprocal(denom, approx=True)
        else:
            p = p / denom
        o = jnp.einsum("gts,gsd->gtd", p.astype(bf16), v,
                       preferred_element_type=jnp.float32)      # (G, T, D)
        # combine_heads + one full-width (K=E) out-projection dot.
        return dot(from_heads(o).astype(bf16), wo_ref, bo_ref)  # (B*T, E)

    # ---- self-attention: x = x + out_proj(SDPA(proj(norm1(x)))) ----
    h1 = _layer_norm(x, ln1w_ref[...], ln1b_ref[...]).astype(bf16)
    x = x + attention(dot(h1, wq1_ref, bq1_ref),
                      dot(h1, wk1_ref, bk1_ref),
                      dot(h1, wv1_ref, bv1_ref),
                      T, wo1_ref, bo1_ref)      # dropout = identity (eval)

    # ---- cross-attention: query from norm2(x), key/value from memory ----
    h2 = _layer_norm(x, ln2w_ref[...], ln2b_ref[...]).astype(bf16)
    mem_b = mem.astype(bf16)
    x = x + attention(dot(h2, wq2_ref, bq2_ref),
                      dot(mem_b, wk2_ref, bk2_ref),
                      dot(mem_b, wv2_ref, bv2_ref),
                      S, wo2_ref, bo2_ref)

    # ---- feed-forward ----
    h3 = _layer_norm(x, ln3w_ref[...], ln3b_ref[...]).astype(bf16)
    u = jnp.maximum(dot(h3, wi_ref, bi_ref), 0.0)   # ReLU in f32
    x = x + dot(u.astype(bf16), wof_ref, bof_ref)

    # ---- lane-dense output: (B*T, E) -> (1, B*T*E) row-major slab ----
    # Built from sublane row slices + a lane concat so the final store is a
    # full-lane (128-multiple) unmasked write.
    flat = jnp.concatenate([x[r:r + 1, :] for r in range(B * T)], axis=1)
    out_ref[...] = flat.astype(out_ref.dtype)


# ------------------------------- the wrapper -------------------------------

def transformer_decoder_layer(x, memory, params, *, heads, approx_softmax=True):
    """x: (B, T, E), memory: (B, S, E).  Returns (B, T, E) float32."""
    B, T, E = x.shape
    _, S, _ = memory.shape
    D = E // heads
    F = params["w_inner"].shape[1]
    wdt = jnp.bfloat16   # weight storage dtype fed to the MXU

    # Host-side weight prep: split the fused QKV / KV projections (columns are
    # already head-major per torch's split_heads on the 3E/2E projection).
    w_qkv, b_qkv = params["w_qkv"], params["b_qkv"]
    wq1, wk1, wv1 = (w_qkv[:, i * E:(i + 1) * E].astype(wdt) for i in range(3))
    bq1, bk1, bv1 = (b_qkv[:, i * E:(i + 1) * E] for i in range(3))
    w_kv, b_kv = params["w_kv"], params["b_kv"]
    wk2, wv2 = (w_kv[:, i * E:(i + 1) * E].astype(wdt) for i in range(2))
    bk2, bv2 = (b_kv[:, i * E:(i + 1) * E] for i in range(2))

    # Order must match the kernel signature.
    args = [
        x.reshape(B * T, E), memory.reshape(B * S, E),
        params["ln1_w"], params["ln1_b"],
        wq1, wk1, wv1, bq1, bk1, bv1,
        params["w_o1"].astype(wdt), params["b_o1"],
        params["ln2_w"], params["ln2_b"],
        params["w_q"].astype(wdt), params["b_q"], wk2, wv2, bk2, bv2,
        params["w_o2"].astype(wdt), params["b_o2"],
        params["ln3_w"], params["ln3_b"],
        params["w_inner"].astype(wdt), params["b_inner"],
        params["w_outer"].astype(wdt), params["b_outer"],
    ]

    # Advisory cost estimate so XLA schedules around the fused call sensibly.
    mm = (3 * T * E * E + 2 * heads * T * T * D + T * E * E            # self-attn
          + T * E * E + 2 * S * E * E + 2 * heads * T * S * D + T * E * E  # cross
          + 2 * T * E * F)                                              # ffn
    cost = pl.CostEstimate(
        flops=2 * B * mm,
        transcendentals=B * heads * T * (T + S),
        bytes_accessed=int(x.size * 4 + memory.size * 4 + B * T * E * 4
                           + sum(int(a.size) * a.dtype.itemsize
                                 for a in args[2:])))

    kernel = functools.partial(decoder_layer_kernel, batch=B, tgt_len=T,
                               src_len=S, heads=heads,
                               approx_softmax=approx_softmax)

    # Gridless call: whole (tiny) layer in one kernel invocation, every
    # operand resident in VMEM once (no pipeline / double-buffering).
    out_flat = pl.pallas_call(
        kernel,
        out_shape=jax.ShapeDtypeStruct((1, B * T * E), jnp.float32),
        cost_estimate=cost,
    )(*args)
    return out_flat.reshape(B, T, E)


# ------------------------- plain-JAX reference (check) ----------------------

def _ref_layer_norm(x, w, b, eps=1e-5):
    mu = jnp.mean(x, axis=-1, keepdims=True)
    var = jnp.mean((x - mu) ** 2, axis=-1, keepdims=True)
    return (x - mu) / jnp.sqrt(var + eps) * w + b


def _ref_mha(q, k, v, heads):
    B, T, E = q.shape
    S = k.shape[1]
    D = E // heads
    qh = q.reshape(B, T, heads, D).transpose(0, 2, 1, 3)
    kh = k.reshape(B, S, heads, D).transpose(0, 2, 1, 3)
    vh = v.reshape(B, S, heads, D).transpose(0, 2, 1, 3)
    s = jnp.einsum("bhtd,bhsd->bhts", qh, kh) / math.sqrt(D)
    p = jax.nn.softmax(s, axis=-1)
    o = jnp.einsum("bhts,bhsd->bhtd", p, vh)
    return o.transpose(0, 2, 1, 3).reshape(B, T, E)


def reference_layer(x, memory, p, *, heads):
    E = x.shape[-1]
    h = _ref_layer_norm(x, p["ln1_w"][0], p["ln1_b"][0])
    qkv = h @ p["w_qkv"] + p["b_qkv"][0]
    y = _ref_mha(qkv[..., :E], qkv[..., E:2 * E], qkv[..., 2 * E:], heads)
    x = x + (y @ p["w_o1"] + p["b_o1"][0])

    h = _ref_layer_norm(x, p["ln2_w"][0], p["ln2_b"][0])
    q = h @ p["w_q"] + p["b_q"][0]
    kv = memory @ p["w_kv"] + p["b_kv"][0]
    y = _ref_mha(q, kv[..., :E], kv[..., E:], heads)
    x = x + (y @ p["w_o2"] + p["b_o2"][0])

    h = _ref_layer_norm(x, p["ln3_w"][0], p["ln3_b"][0])
    y = jnp.maximum(h @ p["w_inner"] + p["b_inner"][0], 0.0)
    x = x + (y @ p["w_outer"] + p["b_outer"][0])
    return x


# ----------------------------------- main -----------------------------------

if __name__ == "__main__":
    B, T, S, E, H, F = 2, 8, 8, 32, 4, 64   # batch, tgt seq, src seq, embed, heads, ffn

    key = jax.random.PRNGKey(0)
    ks = jax.random.split(key, 16)

    def w(k, shape, scale=0.02):
        return (scale * jax.random.normal(k, shape)).astype(jnp.float32)

    params = {
        # LayerNorm params (torch defaults: weight=1, bias=0), shaped (1, E)
        "ln1_w": jnp.ones((1, E), jnp.float32), "ln1_b": jnp.zeros((1, E), jnp.float32),
        "ln2_w": jnp.ones((1, E), jnp.float32), "ln2_b": jnp.zeros((1, E), jnp.float32),
        "ln3_w": jnp.ones((1, E), jnp.float32), "ln3_b": jnp.zeros((1, E), jnp.float32),
        # self-attention: in_proj (E -> 3E, Q|K|V concat), out_proj (E -> E)
        "w_qkv": w(ks[0], (E, 3 * E)), "b_qkv": w(ks[1], (1, 3 * E)),
        "w_o1":  w(ks[2], (E, E)),     "b_o1":  w(ks[3], (1, E)),
        # cross-attention: query_proj (E -> E), value_proj (E -> 2E, K|V), out_proj
        "w_q":   w(ks[4], (E, E)),     "b_q":   w(ks[5], (1, E)),
        "w_kv":  w(ks[6], (E, 2 * E)), "b_kv":  w(ks[7], (1, 2 * E)),
        "w_o2":  w(ks[8], (E, E)),     "b_o2":  w(ks[9], (1, E)),
        # FFN
        "w_inner": w(ks[10], (E, F)),  "b_inner": w(ks[11], (1, F)),
        "w_outer": w(ks[12], (F, E)),  "b_outer": w(ks[13], (1, E)),
    }

    x = jax.random.normal(ks[14], (B, T, E), jnp.float32)
    memory = jax.random.normal(ks[15], (B, S, E), jnp.float32)

    out = transformer_decoder_layer(x, memory, params, heads=H)
    out = jax.block_until_ready(out)

    ref = reference_layer(x, memory, params, heads=H)
    assert out.shape == (B, T, E)
    # bf16 MXU operands + approx reciprocal -> loosen tolerance vs the f32 reference.
    err = jnp.max(jnp.abs(out - ref))
    assert jnp.allclose(out, ref, atol=2e-2, rtol=2e-2), f"max abs err {err}"

    print("KERNEL_OK")
</pallas_src>

<mosaic_0001>
module attributes {stable_mosaic.version = 11 : i64} {
  func.func @decoder_layer_kernel(%arg0: memref<16x32xf32, #tpu.memory_space<vmem>>, %arg1: memref<16x32xf32, #tpu.memory_space<vmem>>, %arg2: memref<1x32xf32, #tpu.memory_space<vmem>>, %arg3: memref<1x32xf32, #tpu.memory_space<vmem>>, %arg4: memref<32x32xbf16, #tpu.memory_space<vmem>>, %arg5: memref<32x32xbf16, #tpu.memory_space<vmem>>, %arg6: memref<32x32xbf16, #tpu.memory_space<vmem>>, %arg7: memref<1x32xf32, #tpu.memory_space<vmem>>, %arg8: memref<1x32xf32, #tpu.memory_space<vmem>>, %arg9: memref<1x32xf32, #tpu.memory_space<vmem>>, %arg10: memref<32x32xbf16, #tpu.memory_space<vmem>>, %arg11: memref<1x32xf32, #tpu.memory_space<vmem>>, %arg12: memref<1x32xf32, #tpu.memory_space<vmem>>, %arg13: memref<1x32xf32, #tpu.memory_space<vmem>>, %arg14: memref<32x32xbf16, #tpu.memory_space<vmem>>, %arg15: memref<1x32xf32, #tpu.memory_space<vmem>>, %arg16: memref<32x32xbf16, #tpu.memory_space<vmem>>, %arg17: memref<32x32xbf16, #tpu.memory_space<vmem>>, %arg18: memref<1x32xf32, #tpu.memory_space<vmem>>, %arg19: memref<1x32xf32, #tpu.memory_space<vmem>>, %arg20: memref<32x32xbf16, #tpu.memory_space<vmem>>, %arg21: memref<1x32xf32, #tpu.memory_space<vmem>>, %arg22: memref<1x32xf32, #tpu.memory_space<vmem>>, %arg23: memref<1x32xf32, #tpu.memory_space<vmem>>, %arg24: memref<32x64xbf16, #tpu.memory_space<vmem>>, %arg25: memref<1x64xf32, #tpu.memory_space<vmem>>, %arg26: memref<64x32xbf16, #tpu.memory_space<vmem>>, %arg27: memref<1x32xf32, #tpu.memory_space<vmem>>, %arg28: memref<1x512xf32, #tpu.memory_space<vmem>>) attributes {dimension_semantics = [], scalar_prefetch = 0 : i64, scratch_operands = 0 : i64, tpu.core_type = #tpu.core_type<tc>} {
    %c0 = arith.constant 0 : index
    %c0_0 = arith.constant 0 : index
    %0 = vector.load %arg0[%c0, %c0_0] : memref<16x32xf32, #tpu.memory_space<vmem>>, vector<16x32xf32>
    %c0_1 = arith.constant 0 : index
    %c0_2 = arith.constant 0 : index
    %1 = vector.load %arg1[%c0_1, %c0_2] : memref<16x32xf32, #tpu.memory_space<vmem>>, vector<16x32xf32>
    %c0_3 = arith.constant 0 : index
    %c0_4 = arith.constant 0 : index
    %2 = vector.load %arg2[%c0_3, %c0_4] : memref<1x32xf32, #tpu.memory_space<vmem>>, vector<1x32xf32>
    %c0_5 = arith.constant 0 : index
    %c0_6 = arith.constant 0 : index
    %3 = vector.load %arg3[%c0_5, %c0_6] : memref<1x32xf32, #tpu.memory_space<vmem>>, vector<1x32xf32>
    %cst = arith.constant dense<0.000000e+00> : vector<16xf32>
    %4 = vector.multi_reduction <add>, %0, %cst [1] : vector<16x32xf32> to vector<16xf32>
    %5 = vector.shape_cast %4 : vector<16xf32> to vector<16x1xf32>
    %cst_7 = arith.constant 3.200000e+01 : f32
    %6 = vector.broadcast %cst_7 : f32 to vector<16x1xf32>
    %7 = arith.divf %5, %6 : vector<16x1xf32>
    %8 = arith.mulf %0, %0 : vector<16x32xf32>
    %cst_8 = arith.constant dense<0.000000e+00> : vector<16xf32>
    %9 = vector.multi_reduction <add>, %8, %cst_8 [1] : vector<16x32xf32> to vector<16xf32>
    %10 = vector.shape_cast %9 : vector<16xf32> to vector<16x1xf32>
    %cst_9 = arith.constant 3.200000e+01 : f32
    %11 = vector.broadcast %cst_9 : f32 to vector<16x1xf32>
    %12 = arith.divf %10, %11 : vector<16x1xf32>
    %13 = arith.mulf %7, %7 : vector<16x1xf32>
    %14 = arith.subf %12, %13 : vector<16x1xf32>
    %15 = vector.broadcast %7 : vector<16x1xf32> to vector<16x32xf32>
    %16 = arith.subf %0, %15 : vector<16x32xf32>
    %cst_10 = arith.constant 9.99999974E-6 : f32
    %17 = vector.broadcast %cst_10 : f32 to vector<16x1xf32>
    %18 = arith.addf %14, %17 : vector<16x1xf32>
    %19 = math.rsqrt %18 : vector<16x1xf32>
    %20 = vector.broadcast %19 : vector<16x1xf32> to vector<16x32xf32>
    %21 = arith.mulf %16, %20 : vector<16x32xf32>
    %22 = vector.broadcast %2 : vector<1x32xf32> to vector<16x32xf32>
    %23 = arith.mulf %21, %22 : vector<16x32xf32>
    %24 = vector.broadcast %3 : vector<1x32xf32> to vector<16x32xf32>
    %25 = arith.addf %23, %24 : vector<16x32xf32>
    %26 = arith.truncf %25 : vector<16x32xf32> to vector<16x32xbf16>
    %c0_11 = arith.constant 0 : index
    %c0_12 = arith.constant 0 : index
    %27 = vector.load %arg4[%c0_11, %c0_12] : memref<32x32xbf16, #tpu.memory_space<vmem>>, vector<32x32xbf16>
    %cst_13 = arith.constant dense<0.000000e+00> : vector<16x32xf32>
    %28 = tpu.matmul %26, %27, %cst_13 {dimension_numbers = #tpu.dot_dimension_numbers<[1], [0], [0], [1], [0, 0, 1, 1], [], []>} : vector<16x32xbf16>, vector<32x32xbf16>, vector<16x32xf32> -> vector<16x32xf32>
    %c0_14 = arith.constant 0 : index
    %c0_15 = arith.constant 0 : index
    %29 = vector.load %arg7[%c0_14, %c0_15] : memref<1x32xf32, #tpu.memory_space<vmem>>, vector<1x32xf32>
    %30 = vector.broadcast %29 : vector<1x32xf32> to vector<16x32xf32>
    %31 = arith.addf %28, %30 : vector<16x32xf32>
    %c0_16 = arith.constant 0 : index
    %c0_17 = arith.constant 0 : index
    %32 = vector.load %arg5[%c0_16, %c0_17] : memref<32x32xbf16, #tpu.memory_space<vmem>>, vector<32x32xbf16>
    %cst_18 = arith.constant dense<0.000000e+00> : vector<16x32xf32>
    %33 = tpu.matmul %26, %32, %cst_18 {dimension_numbers = #tpu.dot_dimension_numbers<[1], [0], [0], [1], [0, 0, 1, 1], [], []>} : vector<16x32xbf16>, vector<32x32xbf16>, vector<16x32xf32> -> vector<16x32xf32>
    %c0_19 = arith.constant 0 : index
    %c0_20 = arith.constant 0 : index
    %34 = vector.load %arg8[%c0_19, %c0_20] : memref<1x32xf32, #tpu.memory_space<vmem>>, vector<1x32xf32>
    %35 = vector.broadcast %34 : vector<1x32xf32> to vector<16x32xf32>
    %36 = arith.addf %33, %35 : vector<16x32xf32>
    %c0_21 = arith.constant 0 : index
    %c0_22 = arith.constant 0 : index
    %37 = vector.load %arg6[%c0_21, %c0_22] : memref<32x32xbf16, #tpu.memory_space<vmem>>, vector<32x32xbf16>
    %cst_23 = arith.constant dense<0.000000e+00> : vector<16x32xf32>
    %38 = tpu.matmul %26, %37, %cst_23 {dimension_numbers = #tpu.dot_dimension_numbers<[1], [0], [0], [1], [0, 0, 1, 1], [], []>} : vector<16x32xbf16>, vector<32x32xbf16>, vector<16x32xf32> -> vector<16x32xf32>
    %c0_24 = arith.constant 0 : index
    %c0_25 = arith.constant 0 : index
    %39 = vector.load %arg9[%c0_24, %c0_25] : memref<1x32xf32, #tpu.memory_space<vmem>>, vector<1x32xf32>
    %40 = vector.broadcast %39 : vector<1x32xf32> to vector<16x32xf32>
    %41 = arith.addf %38, %40 : vector<16x32xf32>
    %42 = vector.extract_strided_slice %31 {offsets = [0, 0], sizes = [16, 8], strides = [1, 1]} : vector<16x32xf32> to vector<16x8xf32>
    %43 = vector.shape_cast %42 : vector<16x8xf32> to vector<2x8x8xf32>
    %44 = vector.extract_strided_slice %31 {offsets = [0, 8], sizes = [16, 8], strides = [1, 1]} : vector<16x32xf32> to vector<16x8xf32>
    %45 = vector.shape_cast %44 : vector<16x8xf32> to vector<2x8x8xf32>
    %46 = vector.extract_strided_slice %31 {offsets = [0, 16], sizes = [16, 8], strides = [1, 1]} : vector<16x32xf32> to vector<16x8xf32>
    %47 = vector.shape_cast %46 : vector<16x8xf32> to vector<2x8x8xf32>
    %48 = vector.extract_strided_slice %31 {offsets = [0, 24], sizes = [16, 8], strides = [1, 1]} : vector<16x32xf32> to vector<16x8xf32>
    %49 = vector.shape_cast %48 : vector<16x8xf32> to vector<2x8x8xf32>
    %50 = tpu.concatenate %43, %45, %47, %49 in 0 : vector<2x8x8xf32>, vector<2x8x8xf32>, vector<2x8x8xf32>, vector<2x8x8xf32> -> vector<8x8x8xf32>
    %51 = arith.truncf %50 : vector<8x8x8xf32> to vector<8x8x8xbf16>
    %52 = vector.extract_strided_slice %36 {offsets = [0, 0], sizes = [16, 8], strides = [1, 1]} : vector<16x32xf32> to vector<16x8xf32>
    %53 = vector.shape_cast %52 : vector<16x8xf32> to vector<2x8x8xf32>
    %54 = vector.extract_strided_slice %36 {offsets = [0, 8], sizes = [16, 8], strides = [1, 1]} : vector<16x32xf32> to vector<16x8xf32>
    %55 = vector.shape_cast %54 : vector<16x8xf32> to vector<2x8x8xf32>
    %56 = vector.extract_strided_slice %36 {offsets = [0, 16], sizes = [16, 8], strides = [1, 1]} : vector<16x32xf32> to vector<16x8xf32>
    %57 = vector.shape_cast %56 : vector<16x8xf32> to vector<2x8x8xf32>
    %58 = vector.extract_strided_slice %36 {offsets = [0, 24], sizes = [16, 8], strides = [1, 1]} : vector<16x32xf32> to vector<16x8xf32>
    %59 = vector.shape_cast %58 : vector<16x8xf32> to vector<2x8x8xf32>
    %60 = tpu.concatenate %53, %55, %57, %59 in 0 : vector<2x8x8xf32>, vector<2x8x8xf32>, vector<2x8x8xf32>, vector<2x8x8xf32> -> vector<8x8x8xf32>
    %61 = arith.truncf %60 : vector<8x8x8xf32> to vector<8x8x8xbf16>
    %62 = vector.extract_strided_slice %41 {offsets = [0, 0], sizes = [16, 8], strides = [1, 1]} : vector<16x32xf32> to vector<16x8xf32>
    %63 = vector.shape_cast %62 : vector<16x8xf32> to vector<2x8x8xf32>
    %64 = vector.extract_strided_slice %41 {offsets = [0, 8], sizes = [16, 8], strides = [1, 1]} : vector<16x32xf32> to vector<16x8xf32>
    %65 = vector.shape_cast %64 : vector<16x8xf32> to vector<2x8x8xf32>
    %66 = vector.extract_strided_slice %41 {offsets = [0, 16], sizes = [16, 8], strides = [1, 1]} : vector<16x32xf32> to vector<16x8xf32>
    %67 = vector.shape_cast %66 : vector<16x8xf32> to vector<2x8x8xf32>
    %68 = vector.extract_strided_slice %41 {offsets = [0, 24], sizes = [16, 8], strides = [1, 1]} : vector<16x32xf32> to vector<16x8xf32>
    %69 = vector.shape_cast %68 : vector<16x8xf32> to vector<2x8x8xf32>
    %70 = tpu.concatenate %63, %65, %67, %69 in 0 : vector<2x8x8xf32>, vector<2x8x8xf32>, vector<2x8x8xf32>, vector<2x8x8xf32> -> vector<8x8x8xf32>
    %71 = arith.truncf %70 : vector<8x8x8xf32> to vector<8x8x8xbf16>
    "tpu.trace_start"() <{level = 10 : i32, message = "gtd,gsd->gts"}> : () -> ()
    %cst_26 = arith.constant dense<0.000000e+00> : vector<8x8x8xf32>
    %72 = tpu.matmul %51, %61, %cst_26 {dimension_numbers = #tpu.dot_dimension_numbers<[2], [2], [1], [1], [0, 0, 0, 1, 1, 1], [0], [0]>} : vector<8x8x8xbf16>, vector<8x8x8xbf16>, vector<8x8x8xf32> -> vector<8x8x8xf32>
    "tpu.trace_stop"() : () -> ()
    %cst_27 = arith.constant 0.353553385 : f32
    %73 = vector.broadcast %cst_27 : f32 to vector<8x8x8xf32>
    %74 = arith.mulf %72, %73 : vector<8x8x8xf32>
    %cst_28 = arith.constant dense<0xFF800000> : vector<8x8xf32>
    %75 = vector.multi_reduction <maximumf>, %74, %cst_28 [2] : vector<8x8x8xf32> to vector<8x8xf32>
    %76 = vector.shape_cast %75 : vector<8x8xf32> to vector<8x8x1xf32>
    %77 = vector.broadcast %76 : vector<8x8x1xf32> to vector<8x8x8xf32>
    %78 = arith.subf %74, %77 : vector<8x8x8xf32>
    %79 = math.exp %78 : vector<8x8x8xf32>
    %cst_29 = arith.constant dense<0.000000e+00> : vector<8x8xf32>
    %80 = vector.multi_reduction <add>, %79, %cst_29 [2] : vector<8x8x8xf32> to vector<8x8xf32>
    %81 = vector.shape_cast %80 : vector<8x8xf32> to vector<8x8x1xf32>
    %82 = tpu.reciprocal %81 {approx = true} : vector<8x8x1xf32> -> vector<8x8x1xf32>
    %83 = vector.broadcast %82 : vector<8x8x1xf32> to vector<8x8x8xf32>
    %84 = arith.mulf %79, %83 : vector<8x8x8xf32>
    %85 = arith.truncf %84 : vector<8x8x8xf32> to vector<8x8x8xbf16>
    "tpu.trace_start"() <{level = 10 : i32, message = "gts,gsd->gtd"}> : () -> ()
    %cst_30 = arith.constant dense<0.000000e+00> : vector<8x8x8xf32>
    %86 = tpu.matmul %85, %71, %cst_30 {dimension_numbers = #tpu.dot_dimension_numbers<[2], [1], [1], [2], [0, 0, 0, 1, 1, 2], [0], [0]>} : vector<8x8x8xbf16>, vector<8x8x8xbf16>, vector<8x8x8xf32> -> vector<8x8x8xf32>
    "tpu.trace_stop"() : () -> ()
    %87 = vector.extract_strided_slice %86 {offsets = [0, 0, 0], sizes = [2, 8, 8], strides = [1, 1, 1]} : vector<8x8x8xf32> to vector<2x8x8xf32>
    %88 = vector.shape_cast %87 : vector<2x8x8xf32> to vector<16x8xf32>
    %89 = vector.extract_strided_slice %86 {offsets = [2, 0, 0], sizes = [2, 8, 8], strides = [1, 1, 1]} : vector<8x8x8xf32> to vector<2x8x8xf32>
    %90 = vector.shape_cast %89 : vector<2x8x8xf32> to vector<16x8xf32>
    %91 = vector.extract_strided_slice %86 {offsets = [4, 0, 0], sizes = [2, 8, 8], strides = [1, 1, 1]} : vector<8x8x8xf32> to vector<2x8x8xf32>
    %92 = vector.shape_cast %91 : vector<2x8x8xf32> to vector<16x8xf32>
    %93 = vector.extract_strided_slice %86 {offsets = [6, 0, 0], sizes = [2, 8, 8], strides = [1, 1, 1]} : vector<8x8x8xf32> to vector<2x8x8xf32>
    %94 = vector.shape_cast %93 : vector<2x8x8xf32> to vector<16x8xf32>
    %95 = tpu.concatenate %88, %90, %92, %94 in 1 : vector<16x8xf32>, vector<16x8xf32>, vector<16x8xf32>, vector<16x8xf32> -> vector<16x32xf32>
    %96 = arith.truncf %95 : vector<16x32xf32> to vector<16x32xbf16>
    %c0_31 = arith.constant 0 : index
    %c0_32 = arith.constant 0 : index
    %97 = vector.load %arg10[%c0_31, %c0_32] : memref<32x32xbf16, #tpu.memory_space<vmem>>, vector<32x32xbf16>
    %cst_33 = arith.constant dense<0.000000e+00> : vector<16x32xf32>
    %98 = tpu.matmul %96, %97, %cst_33 {dimension_numbers = #tpu.dot_dimension_numbers<[1], [0], [0], [1], [0, 0, 1, 1], [], []>} : vector<16x32xbf16>, vector<32x32xbf16>, vector<16x32xf32> -> vector<16x32xf32>
    %c0_34 = arith.constant 0 : index
    %c0_35 = arith.constant 0 : index
    %99 = vector.load %arg11[%c0_34, %c0_35] : memref<1x32xf32, #tpu.memory_space<vmem>>, vector<1x32xf32>
    %100 = vector.broadcast %99 : vector<1x32xf32> to vector<16x32xf32>
    %101 = arith.addf %98, %100 : vector<16x32xf32>
    %102 = arith.addf %0, %101 : vector<16x32xf32>
    %c0_36 = arith.constant 0 : index
    %c0_37 = arith.constant 0 : index
    %103 = vector.load %arg12[%c0_36, %c0_37] : memref<1x32xf32, #tpu.memory_space<vmem>>, vector<1x32xf32>
    %c0_38 = arith.constant 0 : index
    %c0_39 = arith.constant 0 : index
    %104 = vector.load %arg13[%c0_38, %c0_39] : memref<1x32xf32, #tpu.memory_space<vmem>>, vector<1x32xf32>
    %cst_40 = arith.constant dense<0.000000e+00> : vector<16xf32>
    %105 = vector.multi_reduction <add>, %102, %cst_40 [1] : vector<16x32xf32> to vector<16xf32>
    %106 = vector.shape_cast %105 : vector<16xf32> to vector<16x1xf32>
    %cst_41 = arith.constant 3.200000e+01 : f32
    %107 = vector.broadcast %cst_41 : f32 to vector<16x1xf32>
    %108 = arith.divf %106, %107 : vector<16x1xf32>
    %109 = arith.mulf %102, %102 : vector<16x32xf32>
    %cst_42 = arith.constant dense<0.000000e+00> : vector<16xf32>
    %110 = vector.multi_reduction <add>, %109, %cst_42 [1] : vector<16x32xf32> to vector<16xf32>
    %111 = vector.shape_cast %110 : vector<16xf32> to vector<16x1xf32>
    %cst_43 = arith.constant 3.200000e+01 : f32
    %112 = vector.broadcast %cst_43 : f32 to vector<16x1xf32>
    %113 = arith.divf %111, %112 : vector<16x1xf32>
    %114 = arith.mulf %108, %108 : vector<16x1xf32>
    %115 = arith.subf %113, %114 : vector<16x1xf32>
    %116 = vector.broadcast %108 : vector<16x1xf32> to vector<16x32xf32>
    %117 = arith.subf %102, %116 : vector<16x32xf32>
    %cst_44 = arith.constant 9.99999974E-6 : f32
    %118 = vector.broadcast %cst_44 : f32 to vector<16x1xf32>
    %119 = arith.addf %115, %118 : vector<16x1xf32>
    %120 = math.rsqrt %119 : vector<16x1xf32>
    %121 = vector.broadcast %120 : vector<16x1xf32> to vector<16x32xf32>
    %122 = arith.mulf %117, %121 : vector<16x32xf32>
    %123 = vector.broadcast %103 : vector<1x32xf32> to vector<16x32xf32>
    %124 = arith.mulf %122, %123 : vector<16x32xf32>
    %125 = vector.broadcast %104 : vector<1x32xf32> to vector<16x32xf32>
    %126 = arith.addf %124, %125 : vector<16x32xf32>
    %127 = arith.truncf %126 : vector<16x32xf32> to vector<16x32xbf16>
    %128 = arith.truncf %1 : vector<16x32xf32> to vector<16x32xbf16>
    %c0_45 = arith.constant 0 : index
    %c0_46 = arith.constant 0 : index
    %129 = vector.load %arg14[%c0_45, %c0_46] : memref<32x32xbf16, #tpu.memory_space<vmem>>, vector<32x32xbf16>
    %cst_47 = arith.constant dense<0.000000e+00> : vector<16x32xf32>
    %130 = tpu.matmul %127, %129, %cst_47 {dimension_numbers = #tpu.dot_dimension_numbers<[1], [0], [0], [1], [0, 0, 1, 1], [], []>} : vector<16x32xbf16>, vector<32x32xbf16>, vector<16x32xf32> -> vector<16x32xf32>
    %c0_48 = arith.constant 0 : index
    %c0_49 = arith.constant 0 : index
    %131 = vector.load %arg15[%c0_48, %c0_49] : memref<1x32xf32, #tpu.memory_space<vmem>>, vector<1x32xf32>
    %132 = vector.broadcast %131 : vector<1x32xf32> to vector<16x32xf32>
    %133 = arith.addf %130, %132 : vector<16x32xf32>
    %c0_50 = arith.constant 0 : index
    %c0_51 = arith.constant 0 : index
    %134 = vector.load %arg16[%c0_50, %c0_51] : memref<32x32xbf16, #tpu.memory_space<vmem>>, vector<32x32xbf16>
    %cst_52 = arith.constant dense<0.000000e+00> : vector<16x32xf32>
    %135 = tpu.matmul %128, %134, %cst_52 {dimension_numbers = #tpu.dot_dimension_numbers<[1], [0], [0], [1], [0, 0, 1, 1], [], []>} : vector<16x32xbf16>, vector<32x32xbf16>, vector<16x32xf32> -> vector<16x32xf32>
    %c0_53 = arith.constant 0 : index
    %c0_54 = arith.constant 0 : index
    %136 = vector.load %arg18[%c0_53, %c0_54] : memref<1x32xf32, #tpu.memory_space<vmem>>, vector<1x32xf32>
    %137 = vector.broadcast %136 : vector<1x32xf32> to vector<16x32xf32>
    %138 = arith.addf %135, %137 : vector<16x32xf32>
    %c0_55 = arith.constant 0 : index
    %c0_56 = arith.constant 0 : index
    %139 = vector.load %arg17[%c0_55, %c0_56] : memref<32x32xbf16, #tpu.memory_space<vmem>>, vector<32x32xbf16>
    %cst_57 = arith.constant dense<0.000000e+00> : vector<16x32xf32>
    %140 = tpu.matmul %128, %139, %cst_57 {dimension_numbers = #tpu.dot_dimension_numbers<[1], [0], [0], [1], [0, 0, 1, 1], [], []>} : vector<16x32xbf16>, vector<32x32xbf16>, vector<16x32xf32> -> vector<16x32xf32>
    %c0_58 = arith.constant 0 : index
    %c0_59 = arith.constant 0 : index
    %141 = vector.load %arg19[%c0_58, %c0_59] : memref<1x32xf32, #tpu.memory_space<vmem>>, vector<1x32xf32>
    %142 = vector.broadcast %141 : vector<1x32xf32> to vector<16x32xf32>
    %143 = arith.addf %140, %142 : vector<16x32xf32>
    %144 = vector.extract_strided_slice %133 {offsets = [0, 0], sizes = [16, 8], strides = [1, 1]} : vector<16x32xf32> to vector<16x8xf32>
    %145 = vector.shape_cast %144 : vector<16x8xf32> to vector<2x8x8xf32>
    %146 = vector.extract_strided_slice %133 {offsets = [0, 8], sizes = [16, 8], strides = [1, 1]} : vector<16x32xf32> to vector<16x8xf32>
    %147 = vector.shape_cast %146 : vector<16x8xf32> to vector<2x8x8xf32>
    %148 = vector.extract_strided_slice %133 {offsets = [0, 16], sizes = [16, 8], strides = [1, 1]} : vector<16x32xf32> to vector<16x8xf32>
    %149 = vector.shape_cast %148 : vector<16x8xf32> to vector<2x8x8xf32>
    %150 = vector.extract_strided_slice %133 {offsets = [0, 24], sizes = [16, 8], strides = [1, 1]} : vector<16x32xf32> to vector<16x8xf32>
    %151 = vector.shape_cast %150 : vector<16x8xf32> to vector<2x8x8xf32>
    %152 = tpu.concatenate %145, %147, %149, %151 in 0 : vector<2x8x8xf32>, vector<2x8x8xf32>, vector<2x8x8xf32>, vector<2x8x8xf32> -> vector<8x8x8xf32>
    %153 = arith.truncf %152 : vector<8x8x8xf32> to vector<8x8x8xbf16>
    %154 = vector.extract_strided_slice %138 {offsets = [0, 0], sizes = [16, 8], strides = [1, 1]} : vector<16x32xf32> to vector<16x8xf32>
    %155 = vector.shape_cast %154 : vector<16x8xf32> to vector<2x8x8xf32>
    %156 = vector.extract_strided_slice %138 {offsets = [0, 8], sizes = [16, 8], strides = [1, 1]} : vector<16x32xf32> to vector<16x8xf32>
    %157 = vector.shape_cast %156 : vector<16x8xf32> to vector<2x8x8xf32>
    %158 = vector.extract_strided_slice %138 {offsets = [0, 16], sizes = [16, 8], strides = [1, 1]} : vector<16x32xf32> to vector<16x8xf32>
    %159 = vector.shape_cast %158 : vector<16x8xf32> to vector<2x8x8xf32>
    %160 = vector.extract_strided_slice %138 {offsets = [0, 24], sizes = [16, 8], strides = [1, 1]} : vector<16x32xf32> to vector<16x8xf32>
    %161 = vector.shape_cast %160 : vector<16x8xf32> to vector<2x8x8xf32>
    %162 = tpu.concatenate %155, %157, %159, %161 in 0 : vector<2x8x8xf32>, vector<2x8x8xf32>, vector<2x8x8xf32>, vector<2x8x8xf32> -> vector<8x8x8xf32>
    %163 = arith.truncf %162 : vector<8x8x8xf32> to vector<8x8x8xbf16>
    %164 = vector.extract_strided_slice %143 {offsets = [0, 0], sizes = [16, 8], strides = [1, 1]} : vector<16x32xf32> to vector<16x8xf32>
    %165 = vector.shape_cast %164 : vector<16x8xf32> to vector<2x8x8xf32>
    %166 = vector.extract_strided_slice %143 {offsets = [0, 8], sizes = [16, 8], strides = [1, 1]} : vector<16x32xf32> to vector<16x8xf32>
    %167 = vector.shape_cast %166 : vector<16x8xf32> to vector<2x8x8xf32>
    %168 = vector.extract_strided_slice %143 {offsets = [0, 16], sizes = [16, 8], strides = [1, 1]} : vector<16x32xf32> to vector<16x8xf32>
    %169 = vector.shape_cast %168 : vector<16x8xf32> to vector<2x8x8xf32>
    %170 = vector.extract_strided_slice %143 {offsets = [0, 24], sizes = [16, 8], strides = [1, 1]} : vector<16x32xf32> to vector<16x8xf32>
    %171 = vector.shape_cast %170 : vector<16x8xf32> to vector<2x8x8xf32>
    %172 = tpu.concatenate %165, %167, %169, %171 in 0 : vector<2x8x8xf32>, vector<2x8x8xf32>, vector<2x8x8xf32>, vector<2x8x8xf32> -> vector<8x8x8xf32>
    %173 = arith.truncf %172 : vector<8x8x8xf32> to vector<8x8x8xbf16>
    "tpu.trace_start"() <{level = 10 : i32, message = "gtd,gsd->gts"}> : () -> ()
    %cst_60 = arith.constant dense<0.000000e+00> : vector<8x8x8xf32>
    %174 = tpu.matmul %153, %163, %cst_60 {dimension_numbers = #tpu.dot_dimension_numbers<[2], [2], [1], [1], [0, 0, 0, 1, 1, 1], [0], [0]>} : vector<8x8x8xbf16>, vector<8x8x8xbf16>, vector<8x8x8xf32> -> vector<8x8x8xf32>
    "tpu.trace_stop"() : () -> ()
    %cst_61 = arith.constant 0.353553385 : f32
    %175 = vector.broadcast %cst_61 : f32 to vector<8x8x8xf32>
    %176 = arith.mulf %174, %175 : vector<8x8x8xf32>
    %cst_62 = arith.constant dense<0xFF800000> : vector<8x8xf32>
    %177 = vector.multi_reduction <maximumf>, %176, %cst_62 [2] : vector<8x8x8xf32> to vector<8x8xf32>
    %178 = vector.shape_cast %177 : vector<8x8xf32> to vector<8x8x1xf32>
    %179 = vector.broadcast %178 : vector<8x8x1xf32> to vector<8x8x8xf32>
    %180 = arith.subf %176, %179 : vector<8x8x8xf32>
    %181 = math.exp %180 : vector<8x8x8xf32>
    %cst_63 = arith.constant dense<0.000000e+00> : vector<8x8xf32>
    %182 = vector.multi_reduction <add>, %181, %cst_63 [2] : vector<8x8x8xf32> to vector<8x8xf32>
    %183 = vector.shape_cast %182 : vector<8x8xf32> to vector<8x8x1xf32>
    %184 = tpu.reciprocal %183 {approx = true} : vector<8x8x1xf32> -> vector<8x8x1xf32>
    %185 = vector.broadcast %184 : vector<8x8x1xf32> to vector<8x8x8xf32>
    %186 = arith.mulf %181, %185 : vector<8x8x8xf32>
    %187 = arith.truncf %186 : vector<8x8x8xf32> to vector<8x8x8xbf16>
    "tpu.trace_start"() <{level = 10 : i32, message = "gts,gsd->gtd"}> : () -> ()
    %cst_64 = arith.constant dense<0.000000e+00> : vector<8x8x8xf32>
    %188 = tpu.matmul %187, %173, %cst_64 {dimension_numbers = #tpu.dot_dimension_numbers<[2], [1], [1], [2], [0, 0, 0, 1, 1, 2], [0], [0]>} : vector<8x8x8xbf16>, vector<8x8x8xbf16>, vector<8x8x8xf32> -> vector<8x8x8xf32>
    "tpu.trace_stop"() : () -> ()
    %189 = vector.extract_strided_slice %188 {offsets = [0, 0, 0], sizes = [2, 8, 8], strides = [1, 1, 1]} : vector<8x8x8xf32> to vector<2x8x8xf32>
    %190 = vector.shape_cast %189 : vector<2x8x8xf32> to vector<16x8xf32>
    %191 = vector.extract_strided_slice %188 {offsets = [2, 0, 0], sizes = [2, 8, 8], strides = [1, 1, 1]} : vector<8x8x8xf32> to vector<2x8x8xf32>
    %192 = vector.shape_cast %191 : vector<2x8x8xf32> to vector<16x8xf32>
    %193 = vector.extract_strided_slice %188 {offsets = [4, 0, 0], sizes = [2, 8, 8], strides = [1, 1, 1]} : vector<8x8x8xf32> to vector<2x8x8xf32>
    %194 = vector.shape_cast %193 : vector<2x8x8xf32> to vector<16x8xf32>
    %195 = vector.extract_strided_slice %188 {offsets = [6, 0, 0], sizes = [2, 8, 8], strides = [1, 1, 1]} : vector<8x8x8xf32> to vector<2x8x8xf32>
    %196 = vector.shape_cast %195 : vector<2x8x8xf32> to vector<16x8xf32>
    %197 = tpu.concatenate %190, %192, %194, %196 in 1 : vector<16x8xf32>, vector<16x8xf32>, vector<16x8xf32>, vector<16x8xf32> -> vector<16x32xf32>
    %198 = arith.truncf %197 : vector<16x32xf32> to vector<16x32xbf16>
    %c0_65 = arith.constant 0 : index
    %c0_66 = arith.constant 0 : index
    %199 = vector.load %arg20[%c0_65, %c0_66] : memref<32x32xbf16, #tpu.memory_space<vmem>>, vector<32x32xbf16>
    %cst_67 = arith.constant dense<0.000000e+00> : vector<16x32xf32>
    %200 = tpu.matmul %198, %199, %cst_67 {dimension_numbers = #tpu.dot_dimension_numbers<[1], [0], [0], [1], [0, 0, 1, 1], [], []>} : vector<16x32xbf16>, vector<32x32xbf16>, vector<16x32xf32> -> vector<16x32xf32>
    %c0_68 = arith.constant 0 : index
    %c0_69 = arith.constant 0 : index
    %201 = vector.load %arg21[%c0_68, %c0_69] : memref<1x32xf32, #tpu.memory_space<vmem>>, vector<1x32xf32>
    %202 = vector.broadcast %201 : vector<1x32xf32> to vector<16x32xf32>
    %203 = arith.addf %200, %202 : vector<16x32xf32>
    %204 = arith.addf %102, %203 : vector<16x32xf32>
    %c0_70 = arith.constant 0 : index
    %c0_71 = arith.constant 0 : index
    %205 = vector.load %arg22[%c0_70, %c0_71] : memref<1x32xf32, #tpu.memory_space<vmem>>, vector<1x32xf32>
    %c0_72 = arith.constant 0 : index
    %c0_73 = arith.constant 0 : index
    %206 = vector.load %arg23[%c0_72, %c0_73] : memref<1x32xf32, #tpu.memory_space<vmem>>, vector<1x32xf32>
    %cst_74 = arith.constant dense<0.000000e+00> : vector<16xf32>
    %207 = vector.multi_reduction <add>, %204, %cst_74 [1] : vector<16x32xf32> to vector<16xf32>
    %208 = vector.shape_cast %207 : vector<16xf32> to vector<16x1xf32>
    %cst_75 = arith.constant 3.200000e+01 : f32
    %209 = vector.broadcast %cst_75 : f32 to vector<16x1xf32>
    %210 = arith.divf %208, %209 : vector<16x1xf32>
    %211 = arith.mulf %204, %204 : vector<16x32xf32>
    %cst_76 = arith.constant dense<0.000000e+00> : vector<16xf32>
    %212 = vector.multi_reduction <add>, %211, %cst_76 [1] : vector<16x32xf32> to vector<16xf32>
    %213 = vector.shape_cast %212 : vector<16xf32> to vector<16x1xf32>
    %cst_77 = arith.constant 3.200000e+01 : f32
    %214 = vector.broadcast %cst_77 : f32 to vector<16x1xf32>
    %215 = arith.divf %213, %214 : vector<16x1xf32>
    %216 = arith.mulf %210, %210 : vector<16x1xf32>
    %217 = arith.subf %215, %216 : vector<16x1xf32>
    %218 = vector.broadcast %210 : vector<16x1xf32> to vector<16x32xf32>
    %219 = arith.subf %204, %218 : vector<16x32xf32>
    %cst_78 = arith.constant 9.99999974E-6 : f32
    %220 = vector.broadcast %cst_78 : f32 to vector<16x1xf32>
    %221 = arith.addf %217, %220 : vector<16x1xf32>
    %222 = math.rsqrt %221 : vector<16x1xf32>
    %223 = vector.broadcast %222 : vector<16x1xf32> to vector<16x32xf32>
    %224 = arith.mulf %219, %223 : vector<16x32xf32>
    %225 = vector.broadcast %205 : vector<1x32xf32> to vector<16x32xf32>
    %226 = arith.mulf %224, %225 : vector<16x32xf32>
    %227 = vector.broadcast %206 : vector<1x32xf32> to vector<16x32xf32>
    %228 = arith.addf %226, %227 : vector<16x32xf32>
    %229 = arith.truncf %228 : vector<16x32xf32> to vector<16x32xbf16>
    %c0_79 = arith.constant 0 : index
    %c0_80 = arith.constant 0 : index
    %230 = vector.load %arg24[%c0_79, %c0_80] : memref<32x64xbf16, #tpu.memory_space<vmem>>, vector<32x64xbf16>
    %cst_81 = arith.constant dense<0.000000e+00> : vector<16x64xf32>
    %231 = tpu.matmul %229, %230, %cst_81 {dimension_numbers = #tpu.dot_dimension_numbers<[1], [0], [0], [1], [0, 0, 1, 1], [], []>} : vector<16x32xbf16>, vector<32x64xbf16>, vector<16x64xf32> -> vector<16x64xf32>
    %c0_82 = arith.constant 0 : index
    %c0_83 = arith.constant 0 : index
    %232 = vector.load %arg25[%c0_82, %c0_83] : memref<1x64xf32, #tpu.memory_space<vmem>>, vector<1x64xf32>
    %233 = vector.broadcast %232 : vector<1x64xf32> to vector<16x64xf32>
    %234 = arith.addf %231, %233 : vector<16x64xf32>
    %cst_84 = arith.constant 0.000000e+00 : f32
    %235 = vector.broadcast %cst_84 : f32 to vector<16x64xf32>
    %236 = arith.maximumf %234, %235 : vector<16x64xf32>
    %237 = arith.truncf %236 : vector<16x64xf32> to vector<16x64xbf16>
    %c0_85 = arith.constant 0 : index
    %c0_86 = arith.constant 0 : index
    %238 = vector.load %arg26[%c0_85, %c0_86] : memref<64x32xbf16, #tpu.memory_space<vmem>>, vector<64x32xbf16>
    %cst_87 = arith.constant dense<0.000000e+00> : vector<16x32xf32>
    %239 = tpu.matmul %237, %238, %cst_87 {dimension_numbers = #tpu.dot_dimension_numbers<[1], [0], [0], [1], [0, 0, 1, 1], [], []>} : vector<16x64xbf16>, vector<64x32xbf16>, vector<16x32xf32> -> vector<16x32xf32>
    %c0_88 = arith.constant 0 : index
    %c0_89 = arith.constant 0 : index
    %240 = vector.load %arg27[%c0_88, %c0_89] : memref<1x32xf32, #tpu.memory_space<vmem>>, vector<1x32xf32>
    %241 = vector.broadcast %240 : vector<1x32xf32> to vector<16x32xf32>
    %242 = arith.addf %239, %241 : vector<16x32xf32>
    %243 = arith.addf %204, %242 : vector<16x32xf32>
    %244 = vector.extract_strided_slice %243 {offsets = [0, 0], sizes = [1, 32], strides = [1, 1]} : vector<16x32xf32> to vector<1x32xf32>
    %245 = vector.extract_strided_slice %243 {offsets = [1, 0], sizes = [1, 32], strides = [1, 1]} : vector<16x32xf32> to vector<1x32xf32>
    %246 = vector.extract_strided_slice %243 {offsets = [2, 0], sizes = [1, 32], strides = [1, 1]} : vector<16x32xf32> to vector<1x32xf32>
    %247 = vector.extract_strided_slice %243 {offsets = [3, 0], sizes = [1, 32], strides = [1, 1]} : vector<16x32xf32> to vector<1x32xf32>
    %248 = vector.extract_strided_slice %243 {offsets = [4, 0], sizes = [1, 32], strides = [1, 1]} : vector<16x32xf32> to vector<1x32xf32>
    %249 = vector.extract_strided_slice %243 {offsets = [5, 0], sizes = [1, 32], strides = [1, 1]} : vector<16x32xf32> to vector<1x32xf32>
    %250 = vector.extract_strided_slice %243 {offsets = [6, 0], sizes = [1, 32], strides = [1, 1]} : vector<16x32xf32> to vector<1x32xf32>
    %251 = vector.extract_strided_slice %243 {offsets = [7, 0], sizes = [1, 32], strides = [1, 1]} : vector<16x32xf32> to vector<1x32xf32>
    %252 = vector.extract_strided_slice %243 {offsets = [8, 0], sizes = [1, 32], strides = [1, 1]} : vector<16x32xf32> to vector<1x32xf32>
    %253 = vector.extract_strided_slice %243 {offsets = [9, 0], sizes = [1, 32], strides = [1, 1]} : vector<16x32xf32> to vector<1x32xf32>
    %254 = vector.extract_strided_slice %243 {offsets = [10, 0], sizes = [1, 32], strides = [1, 1]} : vector<16x32xf32> to vector<1x32xf32>
    %255 = vector.extract_strided_slice %243 {offsets = [11, 0], sizes = [1, 32], strides = [1, 1]} : vector<16x32xf32> to vector<1x32xf32>
    %256 = vector.extract_strided_slice %243 {offsets = [12, 0], sizes = [1, 32], strides = [1, 1]} : vector<16x32xf32> to vector<1x32xf32>
    %257 = vector.extract_strided_slice %243 {offsets = [13, 0], sizes = [1, 32], strides = [1, 1]} : vector<16x32xf32> to vector<1x32xf32>
    %258 = vector.extract_strided_slice %243 {offsets = [14, 0], sizes = [1, 32], strides = [1, 1]} : vector<16x32xf32> to vector<1x32xf32>
    %259 = vector.extract_strided_slice %243 {offsets = [15, 0], sizes = [1, 32], strides = [1, 1]} : vector<16x32xf32> to vector<1x32xf32>
    %260 = tpu.concatenate %244, %245, %246, %247, %248, %249, %250, %251, %252, %253, %254, %255, %256, %257, %258, %259 in 1 : vector<1x32xf32>, vector<1x32xf32>, vector<1x32xf32>, vector<1x32xf32>, vector<1x32xf32>, vector<1x32xf32>, vector<1x32xf32>, vector<1x32xf32>, vector<1x32xf32>, vector<1x32xf32>, vector<1x32xf32>, vector<1x32xf32>, vector<1x32xf32>, vector<1x32xf32>, vector<1x32xf32>, vector<1x32xf32> -> vector<1x512xf32>
    %c0_90 = arith.constant 0 : index
    %c0_91 = arith.constant 0 : index
    %261 = vector.load %arg28[%c0_90, %c0_91] : memref<1x512xf32, #tpu.memory_space<vmem>>, vector<1x512xf32>
    tpu.vector_store %arg28[%c0_90, %c0_91], %260 {strides = array<i32>} : memref<1x512xf32, #tpu.memory_space<vmem>>, vector<1x512xf32>,
    return
  }
}

</mosaic_0001>

<bundles_post_ra>
// kernel: tpu_custom_call.1
= control target key start
LH: loop header
LB: loop body
LE: loop exit
PB: predicated region body
PF: predicated region fallthrough
CT: control target
= control target key end

     0   :  { %s5125_s0 = inlined_call_operand.vmem [shape: f32[16,32], index: 0, kind: input, shape index: {}]   ;;  %s5126_s1 = inlined_call_operand.vmem [shape: f32[16,32], index: 1, kind: input, shape index: {}]   ;;  %s5127_s2 = inlined_call_operand.hbm [shape: f32[1,32], index: 2, kind: input, shape index: {}]   ;;  %s5128_s3 = inlined_call_operand.hbm [shape: f32[1,32], index: 3, kind: input, shape index: {}]   ;;  %s5129_s4 = inlined_call_operand.vmem [shape: bf16[32,32], index: 4, kind: input, shape index: {}]   ;;  %s5130_s5 = inlined_call_operand.vmem [shape: bf16[32,32], index: 5, kind: input, shape index: {}]   ;;  %s5131_s6 = inlined_call_operand.hbm [shape: bf16[32,32], index: 6, kind: input, shape index: {}]   ;;  %s5132_s7 = inlined_call_operand.hbm [shape: f32[1,32], index: 7, kind: input, shape index: {}]   ;;  %s5133_s8 = inlined_call_operand.hbm [shape: f32[1,32], index: 8, kind: input, shape index: {}]   ;;  %s5134_s9 = inlined_call_operand.hbm [shape: f32[1,32], index: 9, kind: input, shape index: {}]   ;;  %s5135_s10 = inlined_call_operand.vmem [shape: bf16[32,32], index: 10, kind: input, shape index: {}]   ;;  %s5136_s11 = inlined_call_operand.hbm [shape: f32[1,32], index: 11, kind: input, shape index: {}]   ;;  %s5137_s12 = inlined_call_operand.hbm [shape: f32[1,32], index: 12, kind: input, shape index: {}]   ;;  %s5138_s13 = inlined_call_operand.hbm [shape: f32[1,32], index: 13, kind: input, shape index: {}]   ;;  %s5139_s14 = inlined_call_operand.vmem [shape: bf16[32,32], index: 14, kind: input, shape index: {}]   ;;  %s5140_s15 = inlined_call_operand.hbm [shape: f32[1,32], index: 15, kind: input, shape index: {}]   ;;  %s5141_s16 = inlined_call_operand.hbm [shape: bf16[32,32], index: 16, kind: input, shape index: {}]   ;;  %s5142_s17 = inlined_call_operand.vmem [shape: bf16[32,32], index: 17, kind: input, shape index: {}]   ;;  %s5143_s18 = inlined_call_operand.vmem [shape: f32[1,32], index: 18, kind: input, shape index: {}]   ;;  %s5144_s19 = inlined_call_operand.vmem [shape: f32[1,32], index: 19, kind: input, shape index: {}]   ;;  %s5145_s20 = inlined_call_operand.hbm [shape: bf16[32,32], index: 20, kind: input, shape index: {}]   ;;  %s5146_s21 = inlined_call_operand.hbm [shape: f32[1,32], index: 21, kind: input, shape index: {}]   ;;  %s5147_s22 = inlined_call_operand.hbm [shape: f32[1,32], index: 22, kind: input, shape index: {}]   ;;  %s5148_s23 = inlined_call_operand.hbm [shape: f32[1,32], index: 23, kind: input, shape index: {}]   ;;  %s5149_s24 = inlined_call_operand.vmem [shape: bf16[32,64], index: 24, kind: input, shape index: {}]   ;;  %s5150_s25 = inlined_call_operand.hbm [shape: f32[1,64], index: 25, kind: input, shape index: {}]   ;;  %s5151_s26 = inlined_call_operand.vmem [shape: bf16[64,32], index: 26, kind: input, shape index: {}]   ;;  %s5152_s27 = inlined_call_operand.vmem [shape: f32[1,32], index: 27, kind: input, shape index: {}]   ;;  %s5153_s28 = inlined_call_operand.hbm [shape: f32[1,512], index: 28, kind: output, shape index: {}]  }
   0x1   :  { %5168 = sst [smem:[#allocation39_spill]] %s5125_s0 }
   0x2   :  { %5169 = sst [smem:[#allocation40_spill]] %s5126_s1 }
   0x3   :  { %5170 = sst [smem:[#allocation41_spill]] %s5127_s2 }
   0x4   :  { %5171 = sst [smem:[#allocation42_spill]] %s5128_s3 }
   0x5   :  { %5172 = sst [smem:[#allocation43_spill]] %s5129_s4 }
   0x6   :  { %5173 = sst [smem:[#allocation44_spill]] %s5130_s5 }
   0x7   :  { %5174 = sst [smem:[#allocation45_spill]] %s5131_s6 }
   0x8   :  { %5175 = sst [smem:[#allocation46_spill]] %s5132_s7 }
   0x9   :  { %5176 = sst [smem:[#allocation47_spill]] %s5133_s8 }
   0xa   :  { %5177 = sst [smem:[#allocation48_spill]] %s5134_s9 }
   0xb   :  { %5178 = sst [smem:[#allocation49_spill]] %s5135_s10 }
   0xc   :  { %5179 = sst [smem:[#allocation50_spill]] %s5136_s11 }
   0xd   :  { %5180 = sst [smem:[#allocation51_spill]] %s5137_s12 }
   0xe   :  { %5181 = sst [smem:[#allocation52_spill]] %s5153_s28 }
   0xf   :  { %33 = vsyncpa [#allocation3], 0 }
  0x10   :  { %34 = vsyncpa [#allocation6], 0 }
  0x11   :  { %35 = vsyncpa [#allocation9], 0 }
  0x12   :  { %36 = vsyncpa [#allocation12], 0 }
  0x13   :  { %37 = vsyncpa [#allocation15], 0 }
  0x14   :  { %38 = vsyncpa [#allocation18], 0 }
  0x15   :  { %39 = vsyncpa [#allocation21], 0 }
  0x16   :  { %40 = vsyncpa [#allocation24], 0 }
  0x17   :  { %41 = vsyncpa [#allocation27], 0 }
  0x18   :  { %42 = vsyncpa [#allocation4], 0  ;;  %s4257_s8 = smov [#allocation5]   ;;  %s4258_s9 = smov [#allocation8]  }
  0x19   :  { %s63_s5 = sshll.u32 %s4257_s8, 4  ;;  %s89_s30 = sshll.u32 %s4258_s9, 4  ;;  %s64_s5 = int_to_ptr.vmem [resolvable:$true] %s63_s5  ;;  %s90_s30 = int_to_ptr.vmem [resolvable:$true] %s89_s30 }
  0x1a   :  { %s5182_s10 = sld [smem:[#allocation42_spill]] }
  0x20   :  { %s3863_s0 = scalar_lea.hbm %s5182_s10, 16 }
  0x21   :  { %p3864_p0 = scmp.ne.s32.totalorder %s5182_s10, %s3863_s0  ;;  %p3867_p1 = scmp.lt.u32.totalorder %s3863_s0, %s5182_s10 }
  0x23   :  { %p3869_p2 = pnand %p3867_p1, %p3864_p0 }
  0x25   :  { %3872 = shalt.err (!%p3869_p2)
}
  0x26   :  { %s3873_s12 = scalar_lea.vmem %s64_s5, 16  ;;  %s3877_s1 = scalar_lea.vmem %s64_s5, 32 }
  0x27   :  { %p3874_p3 = scmp.ne.s32.totalorder %s64_s5, %s3873_s12  ;;  %p3878_p4 = scmp.lt.s32.totalorder %s64_s5, %s64_s5 }
  0x28   :  { %p3879_p5 = scmp.lt.s32.totalorder %s3877_s1, %s3873_s12 }
  0x2a   :  { %p3880_p6 = por %p3879_p5, %p3878_p4 }
  0x2c   :  { %p3881_p7 = pnand %p3880_p6, %p3874_p3 }
  0x2e   :  { %3884 = shalt.err (!%p3881_p7)
}
  0x2f   :  { %66 = dma.hbm_to_vmem [thread:$0]  %s5182_s10, 16, %s64_s5, [#allocation6]  }
  0x30   :  { %s5183_s6 = sld [smem:[#allocation46_spill]] }
  0x36   :  { %s3885_s11 = scalar_lea.hbm %s5183_s6, 16 }
  0x37   :  { %p3886_p8 = scmp.ne.s32.totalorder %s5183_s6, %s3885_s11  ;;  %p3889_p9 = scmp.lt.u32.totalorder %s3885_s11, %s5183_s6 }
  0x39   :  { %p3891_p10 = pnand %p3889_p9, %p3886_p8 }
  0x3b   :  { %3894 = shalt.err (!%p3891_p10)
}
  0x3c   :  { %s3895_s12 = scalar_lea.vmem %s90_s30, 16  ;;  %s3899_s1 = scalar_lea.vmem %s90_s30, 32 }
  0x3d   :  { %p3896_p11 = scmp.ne.s32.totalorder %s90_s30, %s3895_s12  ;;  %p3900_p12 = scmp.lt.s32.totalorder %s90_s30, %s90_s30 }
  0x3e   :  { %p3901_p13 = scmp.lt.s32.totalorder %s3899_s1, %s3895_s12 }
  0x40   :  { %p3902_p0 = por %p3901_p13, %p3900_p12 }
  0x42   :  { %p3903_p1 = pnand %p3902_p0, %p3896_p11 }
  0x44   :  { %3906 = shalt.err (!%p3903_p1)
}
  0x45   :  { %92 = dma.hbm_to_vmem [thread:$0]  %s5183_s6, 16, %s90_s30, [#allocation9]  }
  0x46   :  { %s4259_s4 = smov [#allocation11]   ;;  %s4260_s9 = smov [#allocation14]  }
  0x47   :  { %s109_s8 = sshll.u32 %s4259_s4, 4  ;;  %s131_s3 = sshll.u32 %s4260_s9, 4  ;;  %s110_s8 = int_to_ptr.vmem [resolvable:$true] %s109_s8  ;;  %s132_s3 = int_to_ptr.vmem [resolvable:$true] %s131_s3 }
  0x48   :  { %s5184_s0 = sld [smem:[#allocation48_spill]] }
  0x4e   :  { %s3907_s2 = scalar_lea.hbm %s5184_s0, 16 }
  0x4f   :  { %p3908_p2 = scmp.ne.s32.totalorder %s5184_s0, %s3907_s2  ;;  %p3911_p3 = scmp.lt.u32.totalorder %s3907_s2, %s5184_s0 }
  0x51   :  { %p3913_p4 = pnand %p3911_p3, %p3908_p2 }
  0x53   :  { %3916 = shalt.err (!%p3913_p4)
}
  0x54   :  { %s3917_s30 = scalar_lea.vmem %s110_s8, 16  ;;  %s3921_s6 = scalar_lea.vmem %s110_s8, 32 }
  0x55   :  { %p3918_p5 = scmp.ne.s32.totalorder %s110_s8, %s3917_s30  ;;  %p3922_p6 = scmp.lt.s32.totalorder %s110_s8, %s110_s8 }
  0x56   :  { %p3923_p7 = scmp.lt.s32.totalorder %s3921_s6, %s3917_s30 }
  0x58   :  { %p3924_p8 = por %p3923_p7, %p3922_p6 }
  0x5a   :  { %p3925_p9 = pnand %p3924_p8, %p3918_p5 }
  0x5c   :  { %3928 = shalt.err (!%p3925_p9)
}
  0x5d   :  { %112 = dma.hbm_to_vmem [thread:$0]  %s5184_s0, 16, %s110_s8, [#allocation12]  }
  0x5e   :  { %s5185_s9 = sld [smem:[#allocation51_spill]] }
  0x64   :  { %s3929_s11 = scalar_lea.hbm %s5185_s9, 16 }
  0x65   :  { %p3930_p10 = scmp.ne.s32.totalorder %s5185_s9, %s3929_s11  ;;  %p3933_p11 = scmp.lt.u32.totalorder %s3929_s11, %s5185_s9 }
  0x67   :  { %p3935_p12 = pnand %p3933_p11, %p3930_p10 }
  0x69   :  { %3938 = shalt.err (!%p3935_p12)
}
  0x6a   :  { %s3939_s1 = scalar_lea.vmem %s132_s3, 16  ;;  %s3943_s30 = scalar_lea.vmem %s132_s3, 32 }
  0x6b   :  { %p3940_p13 = scmp.ne.s32.totalorder %s132_s3, %s3939_s1  ;;  %p3944_p0 = scmp.lt.s32.totalorder %s132_s3, %s132_s3 }
  0x6c   :  { %p3945_p1 = scmp.lt.s32.totalorder %s3943_s30, %s3939_s1 }
  0x6e   :  { %p3946_p2 = por %p3945_p1, %p3944_p0 }
  0x70   :  { %p3947_p3 = pnand %p3946_p2, %p3940_p13 }
  0x72   :  { %3950 = shalt.err (!%p3947_p3)
}
  0x73   :  { %134 = dma.hbm_to_vmem [thread:$0]  %s5185_s9, 16, %s132_s3, [#allocation15]  }
  0x74   :  { %s4261_s6 = smov [#allocation17]   ;;  %s3951_s4 = scalar_lea.hbm %s5140_s15, 16 }
  0x75   :  { %s153_s5 = sshll.u32 %s4261_s6, 4  ;;  %p3952_p4 = scmp.ne.s32.totalorder %s5140_s15, %s3951_s4  ;;  %s154_s5 = int_to_ptr.vmem [resolvable:$true] %s153_s5 }
  0x76   :  { %p3955_p5 = scmp.lt.u32.totalorder %s3951_s4, %s5140_s15 }
  0x78   :  { %p3957_p6 = pnand %p3955_p5, %p3952_p4 }
  0x7a   :  { %3960 = shalt.err (!%p3957_p6)
}
  0x7b   :  { %s3961_s12 = scalar_lea.vmem %s154_s5, 16  ;;  %s3965_s3 = scalar_lea.vmem %s154_s5, 32 }
  0x7c   :  { %p3962_p7 = scmp.ne.s32.totalorder %s154_s5, %s3961_s12  ;;  %p3966_p8 = scmp.lt.s32.totalorder %s154_s5, %s154_s5 }
  0x7d   :  { %p3967_p9 = scmp.lt.s32.totalorder %s3965_s3, %s3961_s12 }
  0x7f   :  { %p3968_p10 = por %p3967_p9, %p3966_p8 }
  0x81   :  { %p3969_p11 = pnand %p3968_p10, %p3962_p7 }
  0x83   :  { %3972 = shalt.err (!%p3969_p11)
}
  0x84   :  { %156 = dma.hbm_to_vmem [thread:$0]  %s5140_s15, 16, %s154_s5, [#allocation18]  }
  0x85   :  { %s4262_s30 = smov [#allocation20]   ;;  %s4263_s0 = smov [#allocation23]  }
  0x86   :  { %s180_s8 = sshll.u32 %s4262_s30, 4  ;;  %s203_s6 = sshll.u32 %s4263_s0, 4  ;;  %s181_s8 = int_to_ptr.vmem [resolvable:$true] %s180_s8  ;;  %s204_s6 = int_to_ptr.vmem [resolvable:$true] %s203_s6 }
  0x87   :  { %s3973_s4 = scalar_lea.hbm %s5145_s20, 256 }
  0x88   :  { %p3974_p12 = scmp.ne.s32.totalorder %s5145_s20, %s3973_s4  ;;  %p3977_p13 = scmp.lt.u32.totalorder %s3973_s4, %s5145_s20 }
  0x8a   :  { %p3979_p0 = pnand %p3977_p13, %p3974_p12 }
  0x8c   :  { %3982 = shalt.err (!%p3979_p0)
}
  0x8d   :  { %s3983_s15 = scalar_lea.vmem %s181_s8, 256  ;;  %p3988_p2 = scmp.lt.s32.totalorder %s181_s8, %s181_s8 }
  0x8e   :  { %p3984_p1 = scmp.ne.s32.totalorder %s181_s8, %s3983_s15  ;;  %p3989_p3 = scmp.lt.s32.totalorder %s3983_s15, %s3983_s15 }
  0x90   :  { %p3990_p4 = por %p3989_p3, %p3988_p2 }
  0x92   :  { %p3991_p5 = pnand %p3990_p4, %p3984_p1 }
  0x94   :  { %3994 = shalt.err (!%p3991_p5)
}
  0x95   :  { %s4264_s5 = smov 64   ;;  %s4265_s12 = smov 4  }
  0x96   :  { %186 = dma.hbm_to_vmem [thread:$0]  %s5145_s20, 256, %s181_s8, [#allocation21], %s4264_s5, %s4264_s5, %s4265_s12  }
  0x97   :  { %s3995_s0 = scalar_lea.hbm %s5147_s22, 16 }
  0x98   :  { %p3996_p6 = scmp.ne.s32.totalorder %s5147_s22, %s3995_s0  ;;  %p3999_p7 = scmp.lt.u32.totalorder %s3995_s0, %s5147_s22 }
  0x9a   :  { %p4001_p8 = pnand %p3999_p7, %p3996_p6 }
  0x9c   :  { %4004 = shalt.err (!%p4001_p8)
}
  0x9d   :  { %s4005_s29 = scalar_lea.vmem %s204_s6, 16  ;;  %s4009_s2 = scalar_lea.vmem %s204_s6, 32 }
  0x9e   :  { %p4006_p9 = scmp.ne.s32.totalorder %s204_s6, %s4005_s29  ;;  %p4010_p10 = scmp.lt.s32.totalorder %s204_s6, %s204_s6 }
  0x9f   :  { %p4011_p11 = scmp.lt.s32.totalorder %s4009_s2, %s4005_s29 }
  0xa1   :  { %p4012_p12 = por %p4011_p11, %p4010_p10 }
  0xa3   :  { %p4013_p13 = pnand %p4012_p12, %p4006_p9 }
  0xa5   :  { %4016 = shalt.err (!%p4013_p13)
}
  0xa6   :  { %206 = dma.hbm_to_vmem [thread:$0]  %s5147_s22, 16, %s204_s6, [#allocation24]  }
  0xa7   :  { %s4266_s7 = smov [#allocation2]   ;;  %s4267_s3 = smov [#allocation7]  }
  0xa8   :  { %s53_s15 = sshll.u32 %s4266_s7, 4  ;;  %s76_s9 = sshll.u32 %s4267_s3, 4  ;;  %s54_s15 = int_to_ptr.vmem [resolvable:$true] %s53_s15  ;;  %s77_s9 = int_to_ptr.vmem [resolvable:$true] %s76_s9 }
  0xa9   :  { %s5186_s0 = sld [smem:[#allocation41_spill]] }
  0xaf   :  { %s4017_s10 = scalar_lea.hbm %s5186_s0, 16 }
  0xb0   :  { %p4018_p0 = scmp.ne.s32.totalorder %s5186_s0, %s4017_s10  ;;  %p4021_p1 = scmp.lt.u32.totalorder %s4017_s10, %s5186_s0 }
  0xb2   :  { %p4023_p2 = pnand %p4021_p1, %p4018_p0 }
  0xb4   :  { %4026 = shalt.err (!%p4023_p2)
}
  0xb5   :  { %s4027_s22 = scalar_lea.vmem %s54_s15, 16  ;;  %s4031_s6 = scalar_lea.vmem %s54_s15, 32 }
  0xb6   :  { %p4028_p3 = scmp.ne.s32.totalorder %s54_s15, %s4027_s22  ;;  %p4032_p4 = scmp.lt.s32.totalorder %s54_s15, %s54_s15 }
  0xb7   :  { %p4033_p5 = scmp.lt.s32.totalorder %s4031_s6, %s4027_s22 }
  0xb9   :  { %p4034_p6 = por %p4033_p5, %p4032_p4 }
  0xbb   :  { %p4035_p7 = pnand %p4034_p6, %p4028_p3 }
  0xbd   :  { %4038 = shalt.err (!%p4035_p7)
}
  0xbe   :  { %56 = dma.hbm_to_vmem [thread:$0]  %s5186_s0, 16, %s54_s15, [#allocation3]  }
  0xbf   :  { %s5187_s3 = sld [smem:[#allocation45_spill]] }
  0xc5   :  { %s4039_s1 = scalar_lea.hbm %s5187_s3, 256 }
  0xc6   :  { %p4040_p8 = scmp.ne.s32.totalorder %s5187_s3, %s4039_s1  ;;  %p4043_p9 = scmp.lt.u32.totalorder %s4039_s1, %s5187_s3 }
  0xc8   :  { %p4045_p10 = pnand %p4043_p9, %p4040_p8 }
  0xca   :  { %4048 = shalt.err (!%p4045_p10)
}
  0xcb   :  { %s4049_s11 = scalar_lea.vmem %s77_s9, 256  ;;  %p4054_p12 = scmp.lt.s32.totalorder %s77_s9, %s77_s9 }
  0xcc   :  { %p4050_p11 = scmp.ne.s32.totalorder %s77_s9, %s4049_s11  ;;  %p4055_p13 = scmp.lt.s32.totalorder %s4049_s11, %s4049_s11 }
  0xce   :  { %p4056_p0 = por %p4055_p13, %p4054_p12 }
  0xd0   :  { %p4057_p1 = pnand %p4056_p0, %p4050_p11 }
  0xd2   :  { %4060 = shalt.err (!%p4057_p1)
}
  0xd3   :  { %82 = dma.hbm_to_vmem [thread:$0]  %s5187_s3, 256, %s77_s9, [#allocation6], %s4264_s5, %s4264_s5, %s4265_s12  }
  0xd4   :  { %s4268_s29 = smov [#allocation10]   ;;  %s4269_s6 = smov [#allocation13]  }
  0xd5   :  { %s99_s22 = sshll.u32 %s4268_s29, 4  ;;  %s121_s2 = sshll.u32 %s4269_s6, 4  ;;  %s100_s22 = int_to_ptr.vmem [resolvable:$true] %s99_s22  ;;  %s122_s2 = int_to_ptr.vmem [resolvable:$true] %s121_s2 }
  0xd6   :  { %s5188_s7 = sld [smem:[#allocation47_spill]] }
  0xdc   :  { %s4061_s1 = scalar_lea.hbm %s5188_s7, 16 }
  0xdd   :  { %p4062_p2 = scmp.ne.s32.totalorder %s5188_s7, %s4061_s1  ;;  %p4065_p3 = scmp.lt.u32.totalorder %s4061_s1, %s5188_s7 }
  0xdf   :  { %p4067_p4 = pnand %p4065_p3, %p4062_p2 }
  0xe1   :  { %4070 = shalt.err (!%p4067_p4)
}
  0xe2   :  { %s4071_s9 = scalar_lea.vmem %s100_s22, 16  ;;  %s4075_s3 = scalar_lea.vmem %s100_s22, 32 }
  0xe3   :  { %p4072_p5 = scmp.ne.s32.totalorder %s100_s22, %s4071_s9  ;;  %p4076_p6 = scmp.lt.s32.totalorder %s100_s22, %s100_s22 }
  0xe4   :  { %p4077_p7 = scmp.lt.s32.totalorder %s4075_s3, %s4071_s9 }
  0xe6   :  { %p4078_p8 = por %p4077_p7, %p4076_p6 }
  0xe8   :  { %p4079_p9 = pnand %p4078_p8, %p4072_p5 }
  0xea   :  { %4082 = shalt.err (!%p4079_p9)
}
  0xeb   :  { %102 = dma.hbm_to_vmem [thread:$0]  %s5188_s7, 16, %s100_s22, [#allocation9]  }
  0xec   :  { %s5189_s6 = sld [smem:[#allocation50_spill]] }
  0xf2   :  { %s4083_s20 = scalar_lea.hbm %s5189_s6, 16 }
  0xf3   :  { %p4084_p10 = scmp.ne.s32.totalorder %s5189_s6, %s4083_s20  ;;  %p4087_p11 = scmp.lt.u32.totalorder %s4083_s20, %s5189_s6 }
  0xf5   :  { %p4089_p12 = pnand %p4087_p11, %p4084_p10 }
  0xf7   :  { %4092 = shalt.err (!%p4089_p12)
}
  0xf8   :  { %s4093_s28 = scalar_lea.vmem %s122_s2, 16  ;;  %s4097_s4 = scalar_lea.vmem %s122_s2, 32 }
  0xf9   :  { %p4094_p13 = scmp.ne.s32.totalorder %s122_s2, %s4093_s28  ;;  %p4098_p0 = scmp.lt.s32.totalorder %s122_s2, %s122_s2 }
  0xfa   :  { %p4099_p1 = scmp.lt.s32.totalorder %s4097_s4, %s4093_s28 }
  0xfc   :  { %p4100_p2 = por %p4099_p1, %p4098_p0 }
  0xfe   :  { %p4101_p3 = pnand %p4100_p2, %p4094_p13 }
 0x100   :  { %4104 = shalt.err (!%p4101_p3)
}
 0x101   :  { %124 = dma.hbm_to_vmem [thread:$0]  %s5189_s6, 16, %s122_s2, [#allocation12]  }
 0x102   :  { %s4270_s9 = smov [#allocation16]   ;;  %s4271_s11 = smov [#allocation19]  }
 0x103   :  { %s141_s3 = sshll.u32 %s4270_s9, 4  ;;  %s162_s15 = sshll.u32 %s4271_s11, 4  ;;  %s142_s3 = int_to_ptr.vmem [resolvable:$true] %s141_s3  ;;  %s163_s15 = int_to_ptr.vmem [resolvable:$true] %s162_s15 }
 0x104   :  { %s4105_s20 = scalar_lea.hbm %s5138_s13, 16 }
 0x105   :  { %p4106_p4 = scmp.ne.s32.totalorder %s5138_s13, %s4105_s20  ;;  %p4109_p5 = scmp.lt.u32.totalorder %s4105_s20, %s5138_s13 }
 0x107   :  { %p4111_p6 = pnand %p4109_p5, %p4106_p4 }
 0x109   :  { %4114 = shalt.err (!%p4111_p6)
}
 0x10a   :  { %s4115_s2 = scalar_lea.vmem %s142_s3, 16  ;;  %s4119_s6 = scalar_lea.vmem %s142_s3, 32 }
 0x10b   :  { %p4116_p7 = scmp.ne.s32.totalorder %s142_s3, %s4115_s2  ;;  %p4120_p8 = scmp.lt.s32.totalorder %s142_s3, %s142_s3 }
 0x10c   :  { %p4121_p9 = scmp.lt.s32.totalorder %s4119_s6, %s4115_s2 }
 0x10e   :  { %p4122_p10 = por %p4121_p9, %p4120_p8 }
 0x110   :  { %p4123_p11 = pnand %p4122_p10, %p4116_p7 }
 0x112   :  { %4126 = shalt.err (!%p4123_p11)
}
 0x113   :  { %144 = dma.hbm_to_vmem [thread:$0]  %s5138_s13, 16, %s142_s3, [#allocation15]  }
 0x114   :  { %s4127_s9 = scalar_lea.hbm %s5141_s16, 256 }
 0x115   :  { %p4128_p12 = scmp.ne.s32.totalorder %s5141_s16, %s4127_s9  ;;  %p4131_p13 = scmp.lt.u32.totalorder %s4127_s9, %s5141_s16 }
 0x117   :  { %p4133_p0 = pnand %p4131_p13, %p4128_p12 }
 0x119   :  { %4136 = shalt.err (!%p4133_p0)
}
 0x11a   :  { %s4137_s8 = scalar_lea.vmem %s163_s15, 256  ;;  %p4142_p2 = scmp.lt.s32.totalorder %s163_s15, %s163_s15 }
 0x11b   :  { %p4138_p1 = scmp.ne.s32.totalorder %s163_s15, %s4137_s8  ;;  %p4143_p3 = scmp.lt.s32.totalorder %s4137_s8, %s4137_s8 }
 0x11d   :  { %p4144_p4 = por %p4143_p3, %p4142_p2 }
 0x11f   :  { %p4145_p5 = pnand %p4144_p4, %p4138_p1 }
 0x121   :  { %4148 = shalt.err (!%p4145_p5)
}
 0x122   :  { %168 = dma.hbm_to_vmem [thread:$0]  %s5141_s16, 256, %s163_s15, [#allocation18], %s4264_s5, %s4264_s5, %s4265_s12  }
 0x123   :  { %s4272_s1 = smov [#allocation22]   ;;  %s4273_s10 = smov [#allocation25]  }
 0x124   :  { %s193_s30 = sshll.u32 %s4272_s1, 4  ;;  %s213_s2 = sshll.u32 %s4273_s10, 4  ;;  %s194_s30 = int_to_ptr.vmem [resolvable:$true] %s193_s30  ;;  %s214_s2 = int_to_ptr.vmem [resolvable:$true] %s213_s2 }
 0x125   :  { %s4149_s4 = scalar_lea.hbm %s5146_s21, 16 }
 0x126   :  { %p4150_p6 = scmp.ne.s32.totalorder %s5146_s21, %s4149_s4  ;;  %p4153_p7 = scmp.lt.u32.totalorder %s4149_s4, %s5146_s21 }
 0x128   :  { %p4155_p8 = pnand %p4153_p7, %p4150_p6 }
 0x12a   :  { %4158 = shalt.err (!%p4155_p8)
}
 0x12b   :  { %s4159_s16 = scalar_lea.vmem %s194_s30, 16  ;;  %s4163_s12 = scalar_lea.vmem %s194_s30, 32 }
 0x12c   :  { %p4160_p9 = scmp.ne.s32.totalorder %s194_s30, %s4159_s16  ;;  %p4164_p10 = scmp.lt.s32.totalorder %s194_s30, %s194_s30 }
 0x12d   :  { %p4165_p11 = scmp.lt.s32.totalorder %s4163_s12, %s4159_s16 }
 0x12f   :  { %p4166_p12 = por %p4165_p11, %p4164_p10 }
 0x131   :  { %p4167_p13 = pnand %p4166_p12, %p4160_p9 }
 0x133   :  { %4170 = shalt.err (!%p4167_p13)
}
 0x134   :  { %196 = dma.hbm_to_vmem [thread:$0]  %s5146_s21, 16, %s194_s30, [#allocation21]  }
 0x135   :  { %s4171_s8 = scalar_lea.hbm %s5148_s23, 16 }
 0x136   :  { %p4172_p0 = scmp.ne.s32.totalorder %s5148_s23, %s4171_s8  ;;  %p4175_p1 = scmp.lt.u32.totalorder %s4171_s8, %s5148_s23 }
 0x138   :  { %p4177_p2 = pnand %p4175_p1, %p4172_p0 }
 0x13a   :  { %4180 = shalt.err (!%p4177_p2)
}
 0x13b   :  { %s4181_s6 = scalar_lea.vmem %s214_s2, 16  ;;  %s4185_s28 = scalar_lea.vmem %s214_s2, 32 }
 0x13c   :  { %p4182_p3 = scmp.ne.s32.totalorder %s214_s2, %s4181_s6  ;;  %p4186_p4 = scmp.lt.s32.totalorder %s214_s2, %s214_s2 }
 0x13d   :  { %p4187_p5 = scmp.lt.s32.totalorder %s4185_s28, %s4181_s6 }
 0x13f   :  { %p4188_p6 = por %p4187_p5, %p4186_p4 }
 0x141   :  { %p4189_p7 = pnand %p4188_p6, %p4182_p3 }
 0x143   :  { %4192 = shalt.err (!%p4189_p7)
}
 0x144   :  { %216 = dma.hbm_to_vmem [thread:$0]  %s5148_s23, 16, %s214_s2, [#allocation24]  }
 0x145   :  { %s4274_s4 = smov [#allocation26]   ;;  %s4193_s11 = scalar_lea.hbm %s5150_s25, 16 }
 0x146   :  { %s225_s22 = sshll.u32 %s4274_s4, 4  ;;  %p4194_p8 = scmp.ne.s32.totalorder %s5150_s25, %s4193_s11  ;;  %s226_s22 = int_to_ptr.vmem [resolvable:$true] %s225_s22 }
 0x147   :  { %p4197_p9 = scmp.lt.u32.totalorder %s4193_s11, %s5150_s25 }
 0x149   :  { %p4199_p10 = pnand %p4197_p9, %p4194_p8 }
 0x14b   :  { %4202 = shalt.err (!%p4199_p10)
}
 0x14c   :  { %s4203_s29 = scalar_lea.vmem %s226_s22, 16  ;;  %s4207_s23 = scalar_lea.vmem %s226_s22, 32 }
 0x14d   :  { %p4204_p11 = scmp.ne.s32.totalorder %s226_s22, %s4203_s29  ;;  %p4208_p12 = scmp.lt.s32.totalorder %s226_s22, %s226_s22 }
 0x14e   :  { %p4209_p13 = scmp.lt.s32.totalorder %s4207_s23, %s4203_s29 }
 0x150   :  { %p4210_p0 = por %p4209_p13, %p4208_p12 }
 0x152   :  { %p4211_p1 = pnand %p4210_p0, %p4204_p11 }
 0x154   :  { %4214 = shalt.err (!%p4211_p1)
}
 0x155   :  { %228 = dma.hbm_to_vmem [thread:$0]  %s5150_s25, 16, %s226_s22, [#allocation27]  }
 0x156   :  { %4237 = dma.done.wait [#allocation3], 16  }
 0x157   :  { %4238 = vsyncadd [#allocation3], 4294967280 }
 0x158   :  { %4239 = dma.done.wait [#allocation6], 272  }
 0x159   :  { %4240 = vsyncadd [#allocation6], 4294967024 }
 0x15a   :  { %4241 = dma.done.wait [#allocation9], 32  }
 0x15b   :  { %4242 = vsyncadd [#allocation9], 4294967264 }
 0x15c   :  { %4243 = dma.done.wait [#allocation12], 32  }
 0x15d   :  { %4244 = vsyncadd [#allocation12], 4294967264 }
 0x15e   :  { %4245 = dma.done.wait [#allocation15], 32  }
 0x15f   :  { %4246 = vsyncadd [#allocation15], 4294967264 }
 0x160   :  { %4247 = dma.done.wait [#allocation18], 272  }
 0x161   :  { %4248 = vsyncadd [#allocation18], 4294967024 }
 0x162   :  { %4249 = dma.done.wait [#allocation21], 272  }
 0x163   :  { %4250 = vsyncadd [#allocation21], 4294967024 }
 0x164   :  { %4251 = dma.done.wait [#allocation24], 32  }
 0x165   :  { %4252 = vsyncadd [#allocation24], 4294967264 }
 0x166   :  { %4253 = dma.done.wait [#allocation27], 16  }
 0x167   :  { %4254 = vsyncadd [#allocation27], 4294967280  ;;  %vm288_vm0 = vcmask 261120   ;;  %s5190_s13 = sld [smem:[#allocation39_spill]]  ;;  %s5191_s28 = sld [smem:[#allocation43_spill]]  ;;  %v4275_v10 = vmov 0.0  }
 0x168   :  { %s5192_s4 = sld [smem:[#allocation44_spill]]  ;;  %3337 = vmatprep.subr.bf16.mxu0 %v4275_v10  ;;  %3345 = vmatprep.subr.bf16.mxu1 %v4275_v10  ;;  %vm4276_vm1 = vmmov 0   ;;  %v3161_v30 = vld [vmem:[#allocation2] ss:$0 sm:$0xff]  ;;  %v3162_v35 = vld [vmem:[#allocation5] ss:$0 sm:$0xff] }
 0x169   :  { %3341 = vmatprep.mubr.msk.bf16.mxu0 %vm4276_vm1, %v4275_v10  ;;  %3349 = vmatprep.mubr.msk.bf16.mxu1 %vm4276_vm1, %v4275_v10  ;;  %v3767_v39 = vld [vmem:[#allocation7] sm:$0xff]   ;;  %v3768_v41 = vld [vmem:[#allocation7 + $0x8] sm:$0xff]   ;;  %v3167_v42 = vld [vmem:[#allocation10] ss:$0 sm:$0xff]  ;;  %vm616_vm2 = vcmask 64512   ;;  %s4277_s16 = smov 120  }
 0x16a   :  { %v3163_v43 = vld [vmem:[#allocation8] ss:$0 sm:$0xff]  ;;  %v3171_v61 = vld [vmem:[#allocation11] ss:$0 sm:$0xff]  ;;  %s4278_s12 = smov 104   ;;  %s4279_s15 = smov 112  }
 0x16b   :  { %vm1092_vm3 = vcmask 1043456   ;;  %s5193_s23 = sld [smem:[#allocation49_spill]]  ;;  %s4280_s2 = smov 8   ;;  %vm1484_vm4 = vcmask 130048   ;;  %vm1487_vm5 = vcmask 195584   ;;  %vm2990_vm6 = vcmask 523264  }
 0x16c   :  { %s4281_s20 = smov 16   ;;  %s4282_s3 = smov 24   ;;  %vm3093_vm7 = vcmask 785408  }
 0x16d   :  { %v282_v0 = vld [vmem:[%s5190_s13] sm:$0xff]  ;;  %v283_v1 = vld [vmem:[%s5190_s13 + $0x8] sm:$0xff]  ;;  %s5194_s30 = sld [smem:[#allocation40_spill]] }
 0x16e   :  { %v289_v2 = vsel %vm288_vm0, %v282_v0, 0.0  ;;  %v298_v3 = vmul.f32 %v282_v0, %v282_v0  ;;  %v292_v4 = vsel %vm288_vm0, %v283_v1, 0.0  ;;  %v299_v5 = vmul.f32 %v283_v1, %v283_v1  ;;  %v3763_v8 = vld [vmem:[%s5191_s28] sm:$0xff]   ;;  %v3765_v11 = vld [vmem:[%s5191_s28 + $0x8] sm:$0xff]  }
 0x16f   :  { %290 = vadd.xlane.f32.xlu0 %v289_v2  ;;  %v3764_v9 = vld [vmem:[%s5192_s4] sm:$0xff]   ;;  %3338 = vmatpush3.bf16.msra.mxu0 %v3763_v8  ;;  %v3766_v12 = vld [vmem:[%s5192_s4 + $0x8] sm:$0xff]  }
 0x170   :  { %v300_v6 = vsel %vm288_vm0, %v298_v3, 0.0  ;;  %v303_v7 = vsel %vm288_vm0, %v299_v5, 0.0  ;;  %3346 = vmatpush3.bf16.msra.mxu1 %v3764_v9  ;;  %3339 = vmatprep.subr.bf16.mxu0 %v4275_v10 }
 0x171   :  { %301 = vadd.xlane.f32.xlu1 %v300_v6  ;;  %3347 = vmatprep.subr.bf16.mxu1 %v4275_v10 }
 0x173   :  { %293 = vadd.xlane.f32.xlu0 %v292_v4  ;;  %3340 = vmatpush3.bf16.msra.mxu0 %v3765_v11 }
 0x174   :  { %3348 = vmatpush3.bf16.msra.mxu1 %v3766_v12  ;;  %3353 = vmatprep.subr.bf16.mxu0 %v4275_v10 }
 0x175   :  { %304 = vadd.xlane.f32.xlu1 %v303_v7  ;;  %3361 = vmatprep.subr.bf16.mxu1 %v4275_v10 }
 0x1fc   :  { %v291_v13 = vpop.xlane.xlu0 %290 }
 0x1fd   :  { %v296_v14 = vmul.f32 0.03125, %v291_v13 }
 0x1fe   :  { %v302_v15 = vpop.xlane.xlu1 %301 }
 0x1ff   :  { %v308_v16 = vmul.f32 %v296_v14, %v296_v14  ;;  %v306_v17 = vmul.f32 0.03125, %v302_v15  ;;  %v312_v27 = vsub.f32 %v282_v0, %v296_v14 }
 0x200   :  { %v294_v18 = vpop.xlane.xlu0 %293 }
 0x201   :  { %v310_v19 = vsub.f32 %v306_v17, %v308_v16  ;;  %v297_v20 = vmul.f32 0.03125, %v294_v18 }
 0x202   :  { %v305_v21 = vpop.xlane.xlu1 %304 }
 0x203   :  { %v314_v22 = vadd.f32 1e-05, %v310_v19  ;;  %v309_v23 = vmul.f32 %v297_v20, %v297_v20  ;;  %v307_v24 = vmul.f32 0.03125, %v305_v21  ;;  %v313_v31 = vsub.f32 %v283_v1, %v297_v20 }
 0x205   :  { %3785 = vrsqrt.f32 %v314_v22  ;;  %v311_v25 = vsub.f32 %v307_v24, %v309_v23 }
 0x207   :  { %v315_v26 = vadd.f32 1e-05, %v311_v25 }
 0x209   :  { %3787 = vrsqrt.f32 %v315_v26 }
 0x20f   :  { %v3786_v28 = vpop.eup %3785 }
 0x210   :  { %v318_v29 = vmul.f32 %v3786_v28, %v312_v27 }
 0x212   :  { %v326_v34 = vmul.f32 %v3161_v30, %v318_v29 }
 0x213   :  { %v3788_v32 = vpop.eup %3787 }
 0x214   :  { %v319_v33 = vmul.f32 %v3788_v32, %v313_v31  ;;  %v334_v37 = vadd.f32 %v3162_v35, %v326_v34 }
 0x216   :  { %v327_v36 = vmul.f32 %v3161_v30, %v319_v33 }
 0x218   :  { %v335_v38 = vadd.f32 %v3162_v35, %v327_v36 }
 0x21a   :  { %v336_v40 = vpack.c.bf16 %v335_v38, %v334_v37 }
 0x21c   :  { %3342 = vmatmul.mubr.msk.bf16.vlgmr.msra.gmra.mrb[0].mxu0 %vm288_vm0, %v336_v40  ;;  %3350 = vmatmul.mubr.msk.bf16.vlgmr.msra.gmra.mrb[0].mxu1 %vm288_vm0, %v336_v40 }
 0x21d   :  { %3354 = vmatpush3.bf16.msra.mxu0 %v3767_v39  ;;  %3357 = vmatprep.mubr.msk.bf16.mxu0 %vm4276_vm1, %v4275_v10 }
 0x21e   :  { %3355 = vmatprep.subr.bf16.mxu0 %v4275_v10  ;;  %3363 = vmatprep.mubr.msk.bf16.mxu1 %vm4276_vm1, %v4275_v10 }
 0x221   :  { %3356 = vmatpush3.bf16.msra.mxu0 %v3768_v41 }
 0x222   :  { %3367 = vmatprep.subr.bf16.mxu0 %v4275_v10 }
 0x224   :  { %3358 = vmatmul.mubr.msk.bf16.vlgmr.msra.gmra.mrb[4].mxu0 %vm288_vm0, %v336_v40 }
 0x225   :  { %3369 = vmatprep.mubr.msk.bf16.mxu0 %vm4276_vm1, %v4275_v10 }
 0x2ef   :  { %v397_v44 = vpop.f32.mrb[0].mxu0  ;;  %v461_v45 = vpop.f32.mrb[0].mxu1 }
 0x2f0   :  { %v462_v46 = vadd.f32 %v3167_v42, %v461_v45  ;;  %v3343_v47 = vpop.f32.mrb[1].mxu0  ;;  %v3351_v48 = vpop.f32.mrb[1].mxu1  ;;  %v398_v51 = vadd.f32 %v3163_v43, %v397_v44 }
 0x2f1   :  { %v400_v49 = vpop.f32.mrb[2].mxu0  ;;  %v464_v50 = vpop.f32.mrb[2].mxu1 }
 0x2f2   :  { %v401_v52 = vadd.f32 %v3163_v43, %v400_v49  ;;  %v465_v53 = vadd.f32 %v3167_v42, %v464_v50  ;;  %v3344_v54 = vpop.f32.mrb[3].mxu0  ;;  %v3352_v55 = vpop.f32.mrb[3].mxu1  ;;  %v580_v56 = vpack.c.bf16 %v462_v46, %v462_v46  ;;  %v552_v2 = vpack.c.bf16 %v398_v51, %v398_v51 }
 0x2f4   :  { %v621_v57 = vsel %vm616_vm2, %v580_v56, 0  ;;  %v3643_v58 = vpack.i.bf16 %v465_v53, %v462_v46  ;;  %v3648_v59 = vpack.i.bf16 %v401_v52, %v398_v51  ;;  %v581_v60 = vpack.c.bf16 %v465_v53, %v465_v53 }
 0x2f5   :  { %3362 = vmatpush3.bf16.xpose.msra.mxu1 %v621_v57  ;;  %v553_v7 = vpack.c.bf16 %v401_v52, %v401_v52 }
 0x2f6   :  { %3644 = vrot.lane.b32.xlu0 %v3643_v58, %s4277_s16  ;;  %3649 = vrot.lane.b32.xlu1 %v3648_v59, %s4277_s16  ;;  %v667_v63 = vsel %vm616_vm2, %v581_v60, 0 }
 0x2f7   :  { %v525_v62 = vpop.f32.mrb[4].mxu0  ;;  %3373 = vmatprep.subr.bf16.mxu1 %v4275_v10  ;;  %3368 = vmatpush3.bf16.xpose.msra.mxu0 %v667_v63 }
 0x2f8   :  { %v3359_v0 = vpop.f32.mrb[5].mxu0  ;;  %3379 = vmatprep.subr.bf16.mxu0 %v4275_v10  ;;  %v4682_v3 = vadd.f32 %v3171_v61, %v525_v62 }
 0x2f9   :  { %v528_v1 = vpop.f32.mrb[6].mxu0 }
 0x2fa   :  { %v4684_v4 = vadd.f32 %v3171_v61, %v528_v1  ;;  %3664 = vrot.lane.b32.xlu0 %v3643_v58, %s4278_s12  ;;  %3654 = vrot.lane.b32.xlu1 %v3643_v58, %s4279_s15  ;;  %v3360_v5 = vpop.f32.mrb[7].mxu0  ;;  %v608_v43 = vpack.c.bf16 %v4682_v3, %v4682_v3 }
 0x2fc   :  { %3364 = vmatmul.mubr.msk.bf16.vlgmr.msra.gmra.mrb[4].mxu1 %vm616_vm2, %v552_v2  ;;  %v4691_v6 = vpack.i.bf16 %v4684_v4, %v4682_v3  ;;  %v609_v44 = vpack.c.bf16 %v4684_v4, %v4684_v4  ;;  %v1094_v47 = vsel %vm1092_vm3, %v608_v43, 0 }
 0x2fd   :  { %3375 = vmatprep.mubr.msk.bf16.mxu1 %vm4276_vm1, %v4275_v10 }
 0x2fe   :  { %3659 = vrot.lane.b32.xlu1 %v3648_v59, %s4279_s15  ;;  %3370 = vmatmul.mubr.msk.bf16.vlgmr.msra.gmra.mrb[8].mxu0 %vm616_vm2, %v553_v7  ;;  %v1140_v48 = vsel %vm1092_vm3, %v609_v44, 0 }
 0x2ff   :  { %3381 = vmatprep.mubr.msk.bf16.mxu0 %vm4276_vm1, %v4275_v10 }
 0x302   :  { %3669 = vrot.lane.b32.xlu1 %v3648_v59, %s4278_s12 }
 0x368   :  { %v3645_v8 = vpop.permute.xlu0 %3644  ;;  %v3650_v9 = vpop.permute.xlu1 %3649 }
 0x369   :  { %v3647_v11 = vunpack.i.h.bf16 %v3645_v8  ;;  %v3646_v12 = vunpack.i.l.bf16 %v3645_v8  ;;  %v3651_v20 = vunpack.i.l.bf16 %v3650_v9  ;;  %v3652_v21 = vunpack.i.h.bf16 %v3650_v9 }
 0x36b   :  { %v583_v13 = vpack.c.bf16 %v3647_v11, %v3647_v11  ;;  %v582_v14 = vpack.c.bf16 %v3646_v12, %v3646_v12  ;;  %v554_v25 = vpack.c.bf16 %v3651_v20, %v3651_v20  ;;  %v555_v26 = vpack.c.bf16 %v3652_v21, %v3652_v21 }
 0x36c   :  { %v3655_v15 = vpop.permute.xlu1 %3654  ;;  %v3665_v23 = vpop.permute.xlu0 %3664 }
 0x36d   :  { %v3656_v16 = vunpack.i.l.bf16 %v3655_v15  ;;  %v713_v17 = vsel %vm616_vm2, %v582_v14, 0  ;;  %v759_v18 = vsel %vm616_vm2, %v583_v13, 0  ;;  %v3657_v19 = vunpack.i.h.bf16 %v3655_v15 }
 0x36e   :  { %3374 = vmatpush3.bf16.xpose.msra.mxu1 %v713_v17  ;;  %3380 = vmatpush3.bf16.xpose.msra.mxu0 %v759_v18  ;;  %v3666_v28 = vunpack.i.l.bf16 %v3665_v23  ;;  %v3667_v30 = vunpack.i.h.bf16 %v3665_v23 }
 0x36f   :  { %3385 = vmatprep.subr.bf16.mxu1 %v4275_v10  ;;  %3391 = vmatprep.subr.bf16.mxu0 %v4275_v10  ;;  %v584_v22 = vpack.c.bf16 %v3656_v16, %v3656_v16  ;;  %v585_v24 = vpack.c.bf16 %v3657_v19, %v3657_v19 }
 0x370   :  { %v3660_v27 = vpop.permute.xlu1 %3659  ;;  %v586_v34 = vpack.c.bf16 %v3666_v28, %v3666_v28  ;;  %v587_v35 = vpack.c.bf16 %v3667_v30, %v3667_v30 }
 0x371   :  { %v805_v29 = vsel %vm616_vm2, %v584_v22, 0  ;;  %v851_v31 = vsel %vm616_vm2, %v585_v24, 0  ;;  %v3661_v32 = vunpack.i.l.bf16 %v3660_v27  ;;  %v3662_v33 = vunpack.i.h.bf16 %v3660_v27 }
 0x372   :  { %v897_v39 = vsel %vm616_vm2, %v586_v34, 0  ;;  %v943_v40 = vsel %vm616_vm2, %v587_v35, 0 }
 0x373   :  { %v556_v36 = vpack.c.bf16 %v3661_v32, %v3661_v32  ;;  %v557_v37 = vpack.c.bf16 %v3662_v33, %v3662_v33 }
 0x374   :  { %v3670_v38 = vpop.permute.xlu1 %3669 }
 0x375   :  { %3376 = vmatmul.mubr.msk.bf16.vlgmr.msra.gmra.mrb[8].mxu1 %vm616_vm2, %v554_v25  ;;  %3382 = vmatmul.mubr.msk.bf16.vlgmr.msra.gmra.mrb[12].mxu0 %vm616_vm2, %v555_v26  ;;  %v3671_v41 = vunpack.i.l.bf16 %v3670_v38  ;;  %v3672_v42 = vunpack.i.h.bf16 %v3670_v38 }
 0x376   :  { %3386 = vmatpush3.bf16.xpose.msra.mxu1 %v805_v29  ;;  %3392 = vmatpush3.bf16.xpose.msra.mxu0 %v851_v31 }
 0x377   :  { %3387 = vmatprep.mubr.msk.bf16.mxu1 %vm4276_vm1, %v4275_v10  ;;  %3393 = vmatprep.mubr.msk.bf16.mxu0 %vm4276_vm1, %v4275_v10  ;;  %v558_v45 = vpack.c.bf16 %v3671_v41, %v3671_v41  ;;  %v559_v46 = vpack.c.bf16 %v3672_v42, %v3672_v42 }
 0x378   :  { %3397 = vmatprep.subr.bf16.mxu1 %v4275_v10  ;;  %3403 = vmatprep.subr.bf16.mxu0 %v4275_v10 }
 0x37d   :  { %3388 = vmatmul.mubr.msk.bf16.vlgmr.msra.gmra.mrb[12].mxu1 %vm616_vm2, %v556_v36  ;;  %3394 = vmatmul.mubr.msk.bf16.vlgmr.msra.gmra.mrb[16].mxu0 %vm616_vm2, %v557_v37 }
 0x37e   :  { %3398 = vmatpush3.bf16.xpose.msra.mxu1 %v897_v39  ;;  %3404 = vmatpush3.bf16.xpose.msra.mxu0 %v943_v40 }
 0x37f   :  { %3399 = vmatprep.mubr.msk.bf16.mxu1 %vm4276_vm1, %v4275_v10  ;;  %3405 = vmatprep.mubr.msk.bf16.mxu0 %vm4276_vm1, %v4275_v10 }
 0x380   :  { %3409 = vmatprep.subr.bf16.mxu1 %v4275_v10  ;;  %3415 = vmatprep.subr.bf16.mxu0 %v4275_v10 }
 0x385   :  { %3400 = vmatmul.mubr.msk.bf16.vlgmr.msra.gmra.mrb[16].mxu1 %vm616_vm2, %v558_v45  ;;  %3406 = vmatmul.mubr.msk.bf16.vlgmr.msra.gmra.mrb[20].mxu0 %vm616_vm2, %v559_v46 }
 0x386   :  { %3410 = vmatpush3.bf16.msra.mxu1 %v1094_v47  ;;  %3416 = vmatpush3.bf16.msra.mxu0 %v1140_v48 }
 0x387   :  { %3411 = vmatprep.mubr.msk.bf16.mxu1 %vm4276_vm1, %v4275_v10  ;;  %3417 = vmatprep.mubr.msk.bf16.mxu0 %vm4276_vm1, %v4275_v10 }
 0x388   :  { %3421 = vmatprep.subr.bf16.mxu1 %v4275_v10  ;;  %3427 = vmatprep.subr.bf16.mxu0 %v4275_v10 }
 0x3cf   :  { %v657_v49 = vpop.f32.mrb[4].mxu1 }
 0x3d0   :  { %v985_v50 = vmul.f32 0.35355338, %v657_v49  ;;  %v3365_v51 = vpop.f32.mrb[5].mxu1 }
 0x3d1   :  { %v660_v52 = vpop.f32.mrb[6].mxu1  ;;  %v703_v53 = vpop.f32.mrb[8].mxu0 }
 0x3d2   :  { %v3366_v54 = vpop.f32.mrb[7].mxu1  ;;  %v993_v55 = vsel %vm616_vm2, %v985_v50, -inf  ;;  %v986_v56 = vmul.f32 0.35355338, %v703_v53  ;;  %v3371_v57 = vpop.f32.mrb[9].mxu0 }
 0x3d3   :  { %994 = vmax.xlane.f32.xlu0 %v993_v55  ;;  %v706_v58 = vpop.f32.mrb[10].mxu0 }
 0x3d4   :  { %v3372_v59 = vpop.f32.mrb[11].mxu0  ;;  %v996_v60 = vsel %vm616_vm2, %v986_v56, -inf }
 0x3d5   :  { %997 = vmax.xlane.f32.xlu1 %v996_v60 }
 0x448   :  { %v749_v61 = vpop.f32.mrb[8].mxu1  ;;  %v795_v63 = vpop.f32.mrb[12].mxu0 }
 0x449   :  { %v987_v62 = vmul.f32 0.35355338, %v749_v61  ;;  %v3377_v0 = vpop.f32.mrb[9].mxu1  ;;  %v3383_v1 = vpop.f32.mrb[13].mxu0  ;;  %v988_v3 = vmul.f32 0.35355338, %v795_v63 }
 0x44a   :  { %v752_v2 = vpop.f32.mrb[10].mxu1  ;;  %v798_v4 = vpop.f32.mrb[14].mxu0 }
 0x44b   :  { %v3378_v5 = vpop.f32.mrb[11].mxu1  ;;  %v999_v7 = vsel %vm616_vm2, %v987_v62, -inf  ;;  %v3384_v8 = vpop.f32.mrb[15].mxu0  ;;  %v1002_v9 = vsel %vm616_vm2, %v988_v3, -inf }
 0x44c   :  { %1000 = vmax.xlane.f32.xlu0 %v999_v7 }
 0x450   :  { %v841_v11 = vpop.f32.mrb[12].mxu1  ;;  %1003 = vmax.xlane.f32.xlu0 %v1002_v9  ;;  %v887_v13 = vpop.f32.mrb[16].mxu0 }
 0x451   :  { %v989_v12 = vmul.f32 0.35355338, %v841_v11  ;;  %v3389_v14 = vpop.f32.mrb[13].mxu1  ;;  %v990_v15 = vmul.f32 0.35355338, %v887_v13  ;;  %v3395_v16 = vpop.f32.mrb[17].mxu0 }
 0x452   :  { %v844_v17 = vpop.f32.mrb[14].mxu1  ;;  %v890_v18 = vpop.f32.mrb[18].mxu0 }
 0x453   :  { %v3390_v19 = vpop.f32.mrb[15].mxu1  ;;  %v1005_v20 = vsel %vm616_vm2, %v989_v12, -inf  ;;  %v3396_v21 = vpop.f32.mrb[19].mxu0  ;;  %v1008_v22 = vsel %vm616_vm2, %v990_v15, -inf }
 0x454   :  { %1006 = vmax.xlane.f32.xlu0 %v1005_v20  ;;  %1009 = vmax.xlane.f32.xlu1 %v1008_v22 }
 0x458   :  { %v933_v23 = vpop.f32.mrb[16].mxu1  ;;  %v979_v25 = vpop.f32.mrb[20].mxu0 }
 0x459   :  { %v991_v24 = vmul.f32 0.35355338, %v933_v23  ;;  %v3401_v26 = vpop.f32.mrb[17].mxu1  ;;  %v4744_v27 = vmul.f32 0.35355338, %v979_v25  ;;  %v3407_v28 = vpop.f32.mrb[21].mxu0 }
 0x45a   :  { %v936_v29 = vpop.f32.mrb[18].mxu1  ;;  %v982_v30 = vpop.f32.mrb[22].mxu0 }
 0x45b   :  { %v3402_v31 = vpop.f32.mrb[19].mxu1  ;;  %v1011_v32 = vsel %vm616_vm2, %v991_v24, -inf  ;;  %v3408_v33 = vpop.f32.mrb[23].mxu0  ;;  %v1014_v34 = vsel %vm616_vm2, %v4744_v27, -inf }
 0x45c   :  { %1012 = vmax.xlane.f32.xlu0 %v1011_v32  ;;  %1015 = vmax.xlane.f32.xlu1 %v1014_v34 }
 0x460   :  { %v995_v35 = vpop.xlane.xlu0 %994 }
 0x461   :  { %v1017_v36 = vsub.f32 %v985_v50, %v995_v35 }
 0x462   :  { %v998_v38 = vpop.xlane.xlu1 %997 }
 0x463   :  { %v1025_v37 = vmul.f32 1.442695, %v1017_v36  ;;  %v1018_v39 = vsub.f32 %v986_v56, %v998_v38 }
 0x465   :  { %3789 = vpow2.f32 %v1025_v37  ;;  %v1027_v40 = vmul.f32 1.442695, %v1018_v39 }
 0x467   :  { %3791 = vpow2.f32 %v1027_v40 }
 0x46f   :  { %v3790_v41 = vpop.eup %3789 }
 0x470   :  { %v1041_v42 = vsel %vm616_vm2, %v3790_v41, 0.0 }
 0x471   :  { %1042 = vadd.xlane.f32.xlu0 %v1041_v42  ;;  %v3792_v43 = vpop.eup %3791 }
 0x472   :  { %v1044_v44 = vsel %vm616_vm2, %v3792_v43, 0.0 }
 0x473   :  { %1045 = vadd.xlane.f32.xlu1 %v1044_v44 }
 0x4d9   :  { %v1001_v45 = vpop.xlane.xlu0 %1000 }
 0x4da   :  { %v1019_v46 = vsub.f32 %v987_v62, %v1001_v45 }
 0x4dc   :  { %v1029_v47 = vmul.f32 1.442695, %v1019_v46 }
 0x4dd   :  { %v1004_v48 = vpop.xlane.xlu0 %1003 }
 0x4de   :  { %3793 = vpow2.f32 %v1029_v47  ;;  %v1020_v49 = vsub.f32 %v988_v3, %v1004_v48 }
 0x4e0   :  { %v1031_v50 = vmul.f32 1.442695, %v1020_v49 }
 0x4e1   :  { %v1007_v51 = vpop.xlane.xlu0 %1006  ;;  %v1010_v53 = vpop.xlane.xlu1 %1009 }
 0x4e2   :  { %3795 = vpow2.f32 %v1031_v50  ;;  %v1021_v52 = vsub.f32 %v989_v12, %v1007_v51  ;;  %v1022_v54 = vsub.f32 %v990_v15, %v1010_v53 }
 0x4e4   :  { %v1033_v55 = vmul.f32 1.442695, %v1021_v52  ;;  %v1035_v56 = vmul.f32 1.442695, %v1022_v54 }
 0x4e6   :  { %3797 = vpow2.f32 %v1033_v55 }
 0x4e7   :  { %3799 = vpow2.f32 %v1035_v56 }
 0x4e8   :  { %v3794_v57 = vpop.eup %3793 }
 0x4e9   :  { %v1013_v58 = vpop.xlane.xlu0 %1012  ;;  %v1047_v59 = vsel %vm616_vm2, %v3794_v57, 0.0  ;;  %v1016_v7 = vpop.xlane.xlu1 %1015 }
 0x4ea   :  { %v1023_v60 = vsub.f32 %v991_v24, %v1013_v58  ;;  %1048 = vadd.xlane.f32.xlu0 %v1047_v59  ;;  %v1024_v17 = vsub.f32 %v4744_v27, %v1016_v7 }
 0x4ec   :  { %v3796_v61 = vpop.eup %3795  ;;  %v1037_v62 = vmul.f32 1.442695, %v1023_v60  ;;  %v1039_v18 = vmul.f32 1.442695, %v1024_v17 }
 0x4ed   :  { %v1050_v63 = vsel %vm616_vm2, %v3796_v61, 0.0 }
 0x4ee   :  { %3801 = vpow2.f32 %v1037_v62  ;;  %1051 = vadd.xlane.f32.xlu1 %v1050_v63 }
 0x4f0   :  { %v4753_v0 = vpop.eup %3797 }
 0x4f1   :  { %v4755_v1 = vpop.eup %3799  ;;  %v1053_v2 = vsel %vm616_vm2, %v4753_v0, 0.0 }
 0x4f2   :  { %1054 = vadd.xlane.f32.xlu0 %v1053_v2  ;;  %v1056_v3 = vsel %vm616_vm2, %v4755_v1, 0.0 }
 0x4f3   :  { %1057 = vadd.xlane.f32.xlu1 %v1056_v3 }
 0x4f8   :  { %v4761_v4 = vpop.eup %3801 }
 0x4f9   :  { %v1059_v5 = vsel %vm616_vm2, %v4761_v4, 0.0 }
 0x4fa   :  { %1060 = vadd.xlane.f32.xlu0 %v1059_v5 }
 0x4fe   :  { %v1043_v8 = vpop.xlane.xlu0 %1042 }
 0x4ff   :  { %3803 = vrcp.f32 %v1043_v8 }
 0x500   :  { %v1046_v9 = vpop.xlane.xlu1 %1045 }
 0x501   :  { %3805 = vrcp.f32 %v1046_v9 }
 0x502   :  { %3807 = vpow2.f32 %v1039_v18 }
 0x504   :  { %3679 = vrot.lane.b32.xlu1 %v4691_v6, %s4279_s15 }
 0x509   :  { %v3804_v11 = vpop.eup %3803 }
 0x50a   :  { %v1073_v12 = vmul.f32 %v3804_v11, %v3790_v41 }
 0x50b   :  { %v3806_v13 = vpop.eup %3805 }
 0x50c   :  { %v1081_v14 = vpack.c.bf16 %v1073_v12, %v1073_v12  ;;  %v1074_v15 = vmul.f32 %v3806_v13, %v3792_v43  ;;  %v4776_v19 = vpop.eup %3807  ;;  %v3769_v13 = vld [vmem:[%s5193_s23] sm:$0xff]  }
 0x50d   :  { %v1062_v20 = vsel %vm616_vm2, %v4776_v19, 0.0 }
 0x50e   :  { %3412 = vmatmul.mubr.msk.bf16.vlgmr.msra.gmra.mrb[20].mxu1 %vm616_vm2, %v1081_v14  ;;  %v1082_v16 = vpack.c.bf16 %v1074_v15, %v1074_v15 }
 0x50f   :  { %3423 = vmatprep.mubr.msk.bf16.mxu1 %vm4276_vm1, %v4275_v10 }
 0x510   :  { %3674 = vrot.lane.b32.xlu0 %v4691_v6, %s4277_s16  ;;  %3418 = vmatmul.mubr.msk.bf16.vlgmr.msra.gmra.mrb[24].mxu0 %vm616_vm2, %v1082_v16 }
 0x511   :  { %3429 = vmatprep.mubr.msk.bf16.mxu0 %vm4276_vm1, %v4275_v10 }
 0x528   :  { %1063 = vadd.xlane.f32.xlu1 %v1062_v20 }
 0x539   :  { %3684 = vrot.lane.b32.xlu1 %v4691_v6, %s4278_s12 }
 0x577   :  { %v1049_v21 = vpop.xlane.xlu0 %1048 }
 0x578   :  { %3809 = vrcp.f32 %v1049_v21 }
 0x57b   :  { %v1052_v22 = vpop.xlane.xlu1 %1051 }
 0x57c   :  { %3811 = vrcp.f32 %v1052_v22 }
 0x57f   :  { %v1055_v23 = vpop.xlane.xlu0 %1054 }
 0x580   :  { %v1058_v24 = vpop.xlane.xlu1 %1057  ;;  %3813 = vrcp.f32 %v1055_v23 }
 0x581   :  { %3815 = vrcp.f32 %v1058_v24 }
 0x582   :  { %v3810_v27 = vpop.eup %3809 }
 0x583   :  { %v1075_v34 = vmul.f32 %v3810_v27, %v3794_v57 }
 0x584   :  { %v3680_v26 = vpop.permute.xlu1 %3679 }
 0x585   :  { %v3682_v30 = vunpack.i.h.bf16 %v3680_v26  ;;  %v3681_v31 = vunpack.i.l.bf16 %v3680_v26  ;;  %v1083_v42 = vpack.c.bf16 %v1075_v34, %v1075_v34 }
 0x586   :  { %v3812_v28 = vpop.eup %3811 }
 0x587   :  { %v1061_v25 = vpop.xlane.xlu0 %1060  ;;  %v1076_v35 = vmul.f32 %v3812_v28, %v3796_v61  ;;  %v613_v37 = vpack.c.bf16 %v3682_v30, %v3682_v30  ;;  %v612_v38 = vpack.c.bf16 %v3681_v31, %v3681_v31  ;;  %v3770_v30 = vld [vmem:[%s5193_s23 + $0x8] sm:$0xff]  }
 0x588   :  { %3817 = vrcp.f32 %v1061_v25 }
 0x589   :  { %v1084_v43 = vpack.c.bf16 %v1076_v35, %v1076_v35  ;;  %v1278_v45 = vsel %vm1092_vm3, %v612_v38, 0  ;;  %v1324_v46 = vsel %vm1092_vm3, %v613_v37, 0 }
 0x58a   :  { %v3814_v41 = vpop.eup %3813 }
 0x58b   :  { %v3675_v29 = vpop.permute.xlu0 %3674  ;;  %v3816_v44 = vpop.eup %3815  ;;  %v1077_v47 = vmul.f32 %v3814_v41, %v4753_v0 }
 0x58c   :  { %v3677_v32 = vunpack.i.h.bf16 %v3675_v29  ;;  %v3676_v33 = vunpack.i.l.bf16 %v3675_v29  ;;  %v1078_v48 = vmul.f32 %v3816_v44, %v4755_v1 }
 0x58d   :  { %v1085_v49 = vpack.c.bf16 %v1077_v47, %v1077_v47 }
 0x58e   :  { %v611_v6 = vpack.c.bf16 %v3677_v32, %v3677_v32  ;;  %v610_v36 = vpack.c.bf16 %v3676_v33, %v3676_v33  ;;  %v1086_v50 = vpack.c.bf16 %v1078_v48, %v1078_v48 }
 0x590   :  { %v1186_v39 = vsel %vm1092_vm3, %v610_v36, 0  ;;  %v1232_v40 = vsel %vm1092_vm3, %v611_v6, 0 }
 0x591   :  { %3422 = vmatpush3.bf16.msra.mxu1 %v1186_v39  ;;  %3428 = vmatpush3.bf16.msra.mxu0 %v1232_v40 }
 0x592   :  { %3433 = vmatprep.subr.bf16.mxu1 %v4275_v10  ;;  %3439 = vmatprep.subr.bf16.mxu0 %v4275_v10  ;;  %v3818_v52 = vpop.eup %3817 }
 0x593   :  { %v1079_v56 = vmul.f32 %v3818_v52, %v4761_v4 }
 0x594   :  { %3424 = vmatmul.mubr.msk.bf16.vlgmr.msra.gmra.mrb[24].mxu1 %vm616_vm2, %v1083_v42  ;;  %3430 = vmatmul.mubr.msk.bf16.vlgmr.msra.gmra.mrb[28].mxu0 %vm616_vm2, %v1084_v43 }
 0x595   :  { %3434 = vmatpush3.bf16.msra.mxu1 %v1278_v45  ;;  %3440 = vmatpush3.bf16.msra.mxu0 %v1324_v46  ;;  %v1087_v62 = vpack.c.bf16 %v1079_v56, %v1079_v56 }
 0x596   :  { %3435 = vmatprep.mubr.msk.bf16.mxu1 %vm4276_vm1, %v4275_v10  ;;  %3441 = vmatprep.mubr.msk.bf16.mxu0 %vm4276_vm1, %v4275_v10 }
 0x597   :  { %3445 = vmatprep.subr.bf16.mxu1 %v4275_v10  ;;  %3451 = vmatprep.subr.bf16.mxu0 %v4275_v10 }
 0x59c   :  { %3436 = vmatmul.mubr.msk.bf16.vlgmr.msra.gmra.mrb[28].mxu1 %vm616_vm2, %v1085_v49  ;;  %3442 = vmatmul.mubr.msk.bf16.vlgmr.msra.gmra.mrb[32].mxu0 %vm616_vm2, %v1086_v50 }
 0x59d   :  { %3447 = vmatprep.mubr.msk.bf16.mxu1 %vm4276_vm1, %v4275_v10  ;;  %3453 = vmatprep.mubr.msk.bf16.mxu0 %vm4276_vm1, %v4275_v10 }
 0x5b5   :  { %v1064_v51 = vpop.xlane.xlu1 %1063 }
 0x5b6   :  { %3819 = vrcp.f32 %v1064_v51 }
 0x5b9   :  { %v3685_v53 = vpop.permute.xlu1 %3684 }
 0x5ba   :  { %v3687_v54 = vunpack.i.h.bf16 %v3685_v53  ;;  %v3686_v55 = vunpack.i.l.bf16 %v3685_v53 }
 0x5bc   :  { %v615_v57 = vpack.c.bf16 %v3687_v54, %v3687_v54  ;;  %v614_v58 = vpack.c.bf16 %v3686_v55, %v3686_v55  ;;  %v3191_v55 = vld [vmem:[#allocation13] ss:$0 sm:$0xff] }
 0x5be   :  { %v1370_v59 = vsel %vm1092_vm3, %v614_v58, 0  ;;  %v1416_v60 = vsel %vm1092_vm3, %v615_v57, 0 }
 0x5bf   :  { %3446 = vmatpush3.bf16.msra.mxu1 %v1370_v59  ;;  %3452 = vmatpush3.bf16.msra.mxu0 %v1416_v60  ;;  %v3861_v60 = vld [vmem:[%s5190_s13] sm:$0xff] }
 0x5c0   :  { %v3820_v61 = vpop.eup %3819  ;;  %3457 = vmatprep.subr.bf16.mxu1 %v4275_v10  ;;  %3465 = vmatprep.subr.bf16.mxu0 %v4275_v10 }
 0x5c1   :  { %v1080_v63 = vmul.f32 %v3820_v61, %v4776_v19 }
 0x5c2   :  { %3448 = vmatmul.mubr.msk.bf16.vlgmr.msra.gmra.mrb[32].mxu1 %vm616_vm2, %v1087_v62 }
 0x5c3   :  { %v1088_v0 = vpack.c.bf16 %v1080_v63, %v1080_v63  ;;  %3461 = vmatprep.mubr.msk.bf16.mxu1 %vm4276_vm1, %v4275_v10  ;;  %3458 = vmatpush3.bf16.msra.mxu1 %v3769_v13  ;;  %v285_v13 = vld [vmem:[%s5194_s30 + $0x8] sm:$0xff] }
 0x5c4   :  { %3459 = vmatprep.subr.bf16.mxu1 %v4275_v10 }
 0x5c5   :  { %3454 = vmatmul.mubr.msk.bf16.vlgmr.msra.gmra.mrb[36].mxu0 %vm616_vm2, %v1088_v0  ;;  %v3862_v0 = vld [vmem:[%s5190_s13 + $0x8] sm:$0xff] }
 0x5c6   :  { %3469 = vmatprep.mubr.msk.bf16.mxu0 %vm4276_vm1, %v4275_v10 }
 0x5c7   :  { %3460 = vmatpush3.bf16.msra.mxu1 %v3770_v30 }
 0x5c8   :  { %3473 = vmatprep.subr.bf16.mxu1 %v4275_v10 }
 0x5e1   :  { %v1130_v1 = vpop.f32.mrb[20].mxu1 }
 0x5e2   :  { %v3413_v2 = vpop.f32.mrb[21].mxu1 }
 0x5e3   :  { %v1133_v3 = vpop.f32.mrb[22].mxu1  ;;  %v1176_v4 = vpop.f32.mrb[24].mxu0 }
 0x5e4   :  { %v3414_v5 = vpop.f32.mrb[23].mxu1  ;;  %v3419_v7 = vpop.f32.mrb[25].mxu0 }
 0x5e5   :  { %v1179_v8 = vpop.f32.mrb[26].mxu0 }
 0x5e6   :  { %v3420_v9 = vpop.f32.mrb[27].mxu0 }
 0x5e7   :  { %v3771_v9 = vld [vmem:[#allocation19] sm:$0xff]  }
 0x667   :  { %v1222_v11 = vpop.f32.mrb[24].mxu1  ;;  %v1268_v12 = vpop.f32.mrb[28].mxu0 }
 0x668   :  { %v3688_v14 = vpack.i.bf16 %v1268_v12, %v1222_v11  ;;  %v3425_v15 = vpop.f32.mrb[25].mxu1  ;;  %v3431_v16 = vpop.f32.mrb[29].mxu0  ;;  %v3772_v11 = vld [vmem:[#allocation19 + $0x8] sm:$0xff]   ;;  %v284_v12 = vld [vmem:[%s5194_s30] sm:$0xff] }
 0x669   :  { %v1225_v17 = vpop.f32.mrb[26].mxu1  ;;  %v1271_v18 = vpop.f32.mrb[30].mxu0  ;;  %v3773_v15 = vld [vmem:[%s5139_s14] sm:$0xff]   ;;  %v3774_v16 = vld [vmem:[%s5139_s14 + $0x8] sm:$0xff]  }
 0x66a   :  { %v3426_v19 = vpop.f32.mrb[27].mxu1  ;;  %3689 = vrot.lane.b32.xlu1 %v3688_v14, %s4280_s2  ;;  %v3432_v20 = vpop.f32.mrb[31].mxu0  ;;  %v1609_v14 = vpack.c.bf16 %v285_v13, %v284_v12  ;;  %3466 = vmatpush3.bf16.msra.mxu0 %v3773_v15 }
 0x66b   :  { %3467 = vmatprep.subr.bf16.mxu0 %v4275_v10 }
 0x66e   :  { %3468 = vmatpush3.bf16.msra.mxu0 %v3774_v16 }
 0x66f   :  { %v1314_v21 = vpop.f32.mrb[28].mxu1  ;;  %v1360_v22 = vpop.f32.mrb[32].mxu0  ;;  %3481 = vmatprep.subr.bf16.mxu0 %v4275_v10 }
 0x670   :  { %v3693_v23 = vpack.i.bf16 %v1360_v22, %v1314_v21  ;;  %v3437_v24 = vpop.f32.mrb[29].mxu1  ;;  %v3443_v25 = vpop.f32.mrb[33].mxu0 }
 0x671   :  { %v1317_v26 = vpop.f32.mrb[30].mxu1  ;;  %v1363_v27 = vpop.f32.mrb[34].mxu0 }
 0x672   :  { %v3438_v28 = vpop.f32.mrb[31].mxu1  ;;  %3694 = vrot.lane.b32.xlu0 %v3693_v23, %s4281_s20  ;;  %v3444_v29 = vpop.f32.mrb[35].mxu0 }
 0x695   :  { %v1406_v31 = vpop.f32.mrb[32].mxu1 }
 0x696   :  { %v3449_v32 = vpop.f32.mrb[33].mxu1 }
 0x697   :  { %v1409_v33 = vpop.f32.mrb[34].mxu1 }
 0x698   :  { %v3450_v34 = vpop.f32.mrb[35].mxu1  ;;  %v1452_v35 = vpop.f32.mrb[36].mxu0 }
 0x699   :  { %v3698_v6 = vpack.i.bf16 %v1452_v35, %v1406_v31  ;;  %v3455_v36 = vpop.f32.mrb[37].mxu0  ;;  %v3195_v34 = vld [vmem:[#allocation14] ss:$0 sm:$0xff] }
 0x69a   :  { %v1455_v37 = vpop.f32.mrb[38].mxu0 }
 0x69b   :  { %3699 = vrot.lane.b32.xlu1 %v3698_v6, %s4282_s3  ;;  %v3456_v38 = vpop.f32.mrb[39].mxu0 }
 0x69c   :  { %v3196_v38 = vld [vmem:[#allocation16] ss:$0 sm:$0xff] }
 0x6dc   :  { %v3690_v39 = vpop.permute.xlu1 %3689 }
 0x6dd   :  { %v3692_v41 = vunpack.i.h.bf16 %v3690_v39  ;;  %v3691_v42 = vunpack.i.l.bf16 %v3690_v39 }
 0x6df   :  { %v1483_v46 = vsel %vm616_vm2, %v1176_v4, %v3692_v41  ;;  %v1482_v47 = vsel %vm616_vm2, %v1130_v1, %v3691_v42  ;;  %v3775_v42 = vld [vmem:[%s5142_s17] sm:$0xff]  }
 0x6e4   :  { %v3695_v40 = vpop.permute.xlu0 %3694 }
 0x6e5   :  { %v3697_v43 = vunpack.i.h.bf16 %v3695_v40  ;;  %v3696_v44 = vunpack.i.l.bf16 %v3695_v40 }
 0x6e7   :  { %v1486_v50 = vsel %vm1484_vm4, %v1483_v46, %v3697_v43  ;;  %v1485_v51 = vsel %vm1484_vm4, %v1482_v47, %v3696_v44  ;;  %v3776_v44 = vld [vmem:[%s5142_s17 + $0x8] sm:$0xff]  }
 0x70d   :  { %v3700_v45 = vpop.permute.xlu1 %3699 }
 0x70e   :  { %v3702_v48 = vunpack.i.h.bf16 %v3700_v45  ;;  %v3701_v49 = vunpack.i.l.bf16 %v3700_v45  ;;  %v3201_v45 = vld [vmem:[%s5143_s18] ss:$0 sm:$0xff] }
 0x710   :  { %v1489_v52 = vsel %vm1487_vm5, %v1486_v50, %v3702_v48  ;;  %v1488_v53 = vsel %vm1487_vm5, %v1485_v51, %v3701_v49 }
 0x711   :  { %v1490_v54 = vpack.c.bf16 %v1489_v52, %v1488_v53 }
 0x713   :  { %3462 = vmatmul.mubr.msk.bf16.vlgmr.msra.gmra.mrb[36].mxu1 %vm288_vm0, %v1490_v54 }
 0x714   :  { %3477 = vmatprep.mubr.msk.bf16.mxu1 %vm4276_vm1, %v4275_v10  ;;  %3474 = vmatpush3.bf16.msra.mxu1 %v3771_v9 }
 0x715   :  { %3475 = vmatprep.subr.bf16.mxu1 %v4275_v10 }
 0x718   :  { %3476 = vmatpush3.bf16.msra.mxu1 %v3772_v11 }
 0x719   :  { %3489 = vmatprep.subr.bf16.mxu1 %v4275_v10 }
 0x71b   :  { %3478 = vmatmul.mubr.msk.bf16.vlgmr.msra.gmra.mrb[40].mxu1 %vm288_vm0, %v1609_v14 }
 0x71c   :  { %3491 = vmatprep.mubr.msk.bf16.mxu1 %vm4276_vm1, %v4275_v10 }
 0x7e6   :  { %v1551_v56 = vpop.f32.mrb[36].mxu1 }
 0x7e7   :  { %v1552_v57 = vadd.f32 %v3191_v55, %v1551_v56  ;;  %v3463_v58 = vpop.f32.mrb[37].mxu1 }
 0x7e8   :  { %v1554_v59 = vpop.f32.mrb[38].mxu1 }
 0x7e9   :  { %v4839_v61 = vadd.f32 %v3861_v60, %v1552_v57  ;;  %v1555_v62 = vadd.f32 %v3191_v55, %v1554_v59  ;;  %v3464_v63 = vpop.f32.mrb[39].mxu1  ;;  %v3197_v60 = vld [vmem:[#allocation17] ss:$0 sm:$0xff] }
 0x7eb   :  { %v4844_v1 = vadd.f32 %v3862_v0, %v1555_v62  ;;  %v1562_v2 = vsel %vm288_vm0, %v4839_v61, 0.0  ;;  %v1570_v3 = vmul.f32 %v4839_v61, %v4839_v61 }
 0x7ec   :  { %1563 = vadd.xlane.f32.xlu0 %v1562_v2 }
 0x7ed   :  { %v1565_v4 = vsel %vm288_vm0, %v4844_v1, 0.0  ;;  %v1572_v5 = vsel %vm288_vm0, %v1570_v3, 0.0  ;;  %v1571_v7 = vmul.f32 %v4844_v1, %v4844_v1 }
 0x7ee   :  { %1566 = vadd.xlane.f32.xlu1 %v1565_v4  ;;  %v1737_v46 = vpop.f32.mrb[40].mxu1 }
 0x7ef   :  { %v1575_v8 = vsel %vm288_vm0, %v1571_v7, 0.0  ;;  %v1738_v47 = vadd.f32 %v3201_v45, %v1737_v46  ;;  %v3479_v48 = vpop.f32.mrb[41].mxu1 }
 0x7f0   :  { %1573 = vadd.xlane.f32.xlu0 %v1572_v5  ;;  %v1740_v49 = vpop.f32.mrb[42].mxu1 }
 0x7f1   :  { %v1741_v50 = vadd.f32 %v3201_v45, %v1740_v49  ;;  %v3480_v51 = vpop.f32.mrb[43].mxu1  ;;  %v1856_v52 = vpack.c.bf16 %v1738_v47, %v1738_v47 }
 0x7f3   :  { %v3703_v53 = vpack.i.bf16 %v1741_v50, %v1738_v47  ;;  %v1896_v54 = vsel %vm616_vm2, %v1856_v52, 0  ;;  %v1857_v55 = vpack.c.bf16 %v1741_v50, %v1741_v50 }
 0x7f4   :  { %1576 = vadd.xlane.f32.xlu0 %v1575_v8  ;;  %3490 = vmatpush3.bf16.xpose.msra.mxu1 %v1896_v54 }
 0x7f5   :  { %3501 = vmatprep.subr.bf16.mxu1 %v4275_v10  ;;  %v1942_v56 = vsel %vm616_vm2, %v1857_v55, 0 }
 0x80a   :  { %3704 = vrot.lane.b32.xlu0 %v3703_v53, %s4277_s16 }
 0x80e   :  { %3724 = vrot.lane.b32.xlu0 %v3703_v53, %s4278_s12 }
 0x879   :  { %v1564_v17 = vpop.xlane.xlu0 %1563 }
 0x87a   :  { %v1568_v18 = vmul.f32 0.03125, %v1564_v17 }
 0x87b   :  { %v1567_v19 = vpop.xlane.xlu1 %1566 }
 0x87c   :  { %v1580_v21 = vmul.f32 %v1568_v18, %v1568_v18  ;;  %v1569_v22 = vmul.f32 0.03125, %v1567_v19  ;;  %v1584_v31 = vsub.f32 %v4839_v61, %v1568_v18 }
 0x87d   :  { %v1574_v20 = vpop.xlane.xlu0 %1573 }
 0x87e   :  { %v1578_v23 = vmul.f32 0.03125, %v1574_v20  ;;  %v1581_v26 = vmul.f32 %v1569_v22, %v1569_v22  ;;  %v1585_v35 = vsub.f32 %v4844_v1, %v1569_v22 }
 0x880   :  { %v1582_v24 = vsub.f32 %v1578_v23, %v1580_v21 }
 0x881   :  { %v1577_v25 = vpop.xlane.xlu0 %1576 }
 0x882   :  { %v1586_v27 = vadd.f32 1e-05, %v1582_v24  ;;  %v1579_v28 = vmul.f32 0.03125, %v1577_v25 }
 0x884   :  { %3821 = vrsqrt.f32 %v1586_v27  ;;  %v1583_v29 = vsub.f32 %v1579_v28, %v1581_v26 }
 0x885   :  { %v3705_v57 = vpop.permute.xlu0 %3704 }
 0x886   :  { %v1587_v30 = vadd.f32 1e-05, %v1583_v29  ;;  %v3706_v58 = vunpack.i.l.bf16 %v3705_v57  ;;  %v3707_v59 = vunpack.i.h.bf16 %v3705_v57 }
 0x888   :  { %3823 = vrsqrt.f32 %v1587_v30  ;;  %v1858_v62 = vpack.c.bf16 %v3706_v58, %v3706_v58  ;;  %v1859_v0 = vpack.c.bf16 %v3707_v59, %v3707_v59 }
 0x889   :  { %v3725_v26 = vpop.permute.xlu0 %3724 }
 0x88a   :  { %v1988_v9 = vsel %vm616_vm2, %v1858_v62, 0  ;;  %v2034_v11 = vsel %vm616_vm2, %v1859_v0, 0  ;;  %v3727_v30 = vunpack.i.h.bf16 %v3725_v26 }
 0x88e   :  { %v3822_v32 = vpop.eup %3821 }
 0x88f   :  { %v1590_v33 = vmul.f32 %v3822_v32, %v1584_v31  ;;  %v3726_v31 = vunpack.i.l.bf16 %v3725_v26 }
 0x891   :  { %v1598_v37 = vmul.f32 %v3195_v34, %v1590_v33 }
 0x892   :  { %v3824_v6 = vpop.eup %3823 }
 0x893   :  { %v1591_v36 = vmul.f32 %v3824_v6, %v1585_v35  ;;  %v1606_v40 = vadd.f32 %v3196_v38, %v1598_v37  ;;  %v3205_v6 = vld [vmem:[%s5144_s19] ss:$0 sm:$0xff]  ;;  %v1862_v37 = vpack.c.bf16 %v3726_v31, %v3726_v31 }
 0x895   :  { %v1599_v39 = vmul.f32 %v3195_v34, %v1591_v36  ;;  %v1863_v36 = vpack.c.bf16 %v3727_v30, %v3727_v30 }
 0x897   :  { %v1607_v41 = vadd.f32 %v3196_v38, %v1599_v39 }
 0x899   :  { %v1608_v43 = vpack.c.bf16 %v1607_v41, %v1606_v40 }
 0x89b   :  { %3470 = vmatmul.mubr.msk.bf16.vlgmr.msra.gmra.mrb[40].mxu0 %vm288_vm0, %v1608_v43  ;;  %v2172_v43 = vsel %vm616_vm2, %v1862_v37, 0 }
 0x89c   :  { %3482 = vmatpush3.bf16.msra.mxu0 %v3775_v42  ;;  %3485 = vmatprep.mubr.msk.bf16.mxu0 %vm4276_vm1, %v4275_v10 }
 0x89d   :  { %3483 = vmatprep.subr.bf16.mxu0 %v4275_v10 }
 0x8a0   :  { %3484 = vmatpush3.bf16.msra.mxu0 %v3776_v44  ;;  %v2218_v44 = vsel %vm616_vm2, %v1863_v36, 0 }
 0x8a1   :  { %3495 = vmatprep.subr.bf16.mxu0 %v4275_v10 }
 0x8a3   :  { %3486 = vmatmul.mubr.msk.bf16.vlgmr.msra.gmra.mrb[44].mxu0 %vm288_vm0, %v1609_v14 }
 0x8a4   :  { %3497 = vmatprep.mubr.msk.bf16.mxu0 %vm4276_vm1, %v4275_v10 }
 0x8a9   :  { %3496 = vmatpush3.bf16.xpose.msra.mxu0 %v1942_v56 }
 0x8aa   :  { %3507 = vmatprep.subr.bf16.mxu0 %v4275_v10 }
 0x96e   :  { %v1670_v63 = vpop.f32.mrb[40].mxu0 }
 0x96f   :  { %v1671_v2 = vadd.f32 %v3197_v60, %v1670_v63  ;;  %v3471_v3 = vpop.f32.mrb[41].mxu0 }
 0x970   :  { %v1673_v4 = vpop.f32.mrb[42].mxu0 }
 0x971   :  { %v1828_v5 = vpack.c.bf16 %v1671_v2, %v1671_v2  ;;  %v1674_v7 = vadd.f32 %v3197_v60, %v1673_v4  ;;  %v3472_v8 = vpop.f32.mrb[43].mxu0 }
 0x973   :  { %v1829_v12 = vpack.c.bf16 %v1674_v7, %v1674_v7  ;;  %3492 = vmatmul.mubr.msk.bf16.vlgmr.msra.gmra.mrb[44].mxu1 %vm616_vm2, %v1828_v5  ;;  %v3708_v13 = vpack.i.bf16 %v1674_v7, %v1671_v2 }
 0x974   :  { %3502 = vmatpush3.bf16.xpose.msra.mxu1 %v1988_v9  ;;  %3503 = vmatprep.mubr.msk.bf16.mxu1 %vm4276_vm1, %v4275_v10 }
 0x975   :  { %3709 = vrot.lane.b32.xlu1 %v3708_v13, %s4277_s16  ;;  %3498 = vmatmul.mubr.msk.bf16.vlgmr.msra.gmra.mrb[48].mxu0 %vm616_vm2, %v1829_v12 }
 0x976   :  { %3508 = vmatpush3.bf16.xpose.msra.mxu0 %v2034_v11  ;;  %3509 = vmatprep.mubr.msk.bf16.mxu0 %vm4276_vm1, %v4275_v10  ;;  %v1801_v14 = vpop.f32.mrb[44].mxu0 }
 0x977   :  { %3513 = vmatprep.subr.bf16.mxu1 %v4275_v10  ;;  %3519 = vmatprep.subr.bf16.mxu0 %v4275_v10  ;;  %v3487_v15 = vpop.f32.mrb[45].mxu0  ;;  %v4927_v40 = vadd.f32 %v3205_v6, %v1801_v14 }
 0x978   :  { %v1804_v16 = vpop.f32.mrb[46].mxu0 }
 0x979   :  { %3714 = vrot.lane.b32.xlu1 %v3703_v53, %s4279_s15  ;;  %v3488_v17 = vpop.f32.mrb[47].mxu0  ;;  %v4929_v41 = vadd.f32 %v3205_v6, %v1804_v16  ;;  %v1884_v47 = vpack.c.bf16 %v4927_v40, %v4927_v40 }
 0x97b   :  { %v1885_v48 = vpack.c.bf16 %v4929_v41, %v4929_v41  ;;  %v2368_v51 = vsel %vm1092_vm3, %v1884_v47, 0 }
 0x97d   :  { %3719 = vrot.lane.b32.xlu1 %v3708_v13, %s4279_s15  ;;  %v2414_v52 = vsel %vm1092_vm3, %v1885_v48, 0 }
 0x981   :  { %3729 = vrot.lane.b32.xlu1 %v3708_v13, %s4278_s12 }
 0x9e7   :  { %v3710_v18 = vpop.permute.xlu1 %3709 }
 0x9e8   :  { %v3712_v19 = vunpack.i.h.bf16 %v3710_v18  ;;  %v3711_v20 = vunpack.i.l.bf16 %v3710_v18 }
 0x9ea   :  { %v1831_v21 = vpack.c.bf16 %v3712_v19, %v3712_v19  ;;  %v1830_v22 = vpack.c.bf16 %v3711_v20, %v3711_v20 }
 0x9eb   :  { %v3715_v23 = vpop.permute.xlu1 %3714 }
 0x9ec   :  { %v3717_v24 = vunpack.i.h.bf16 %v3715_v23  ;;  %v3716_v25 = vunpack.i.l.bf16 %v3715_v23  ;;  %3504 = vmatmul.mubr.msk.bf16.vlgmr.msra.gmra.mrb[48].mxu1 %vm616_vm2, %v1830_v22  ;;  %3510 = vmatmul.mubr.msk.bf16.vlgmr.msra.gmra.mrb[52].mxu0 %vm616_vm2, %v1831_v21 }
 0x9ed   :  { %3515 = vmatprep.mubr.msk.bf16.mxu1 %vm4276_vm1, %v4275_v10  ;;  %3521 = vmatprep.mubr.msk.bf16.mxu0 %vm4276_vm1, %v4275_v10 }
 0x9ee   :  { %v1861_v27 = vpack.c.bf16 %v3717_v24, %v3717_v24  ;;  %v1860_v28 = vpack.c.bf16 %v3716_v25, %v3716_v25 }
 0x9ef   :  { %v3720_v29 = vpop.permute.xlu1 %3719 }
 0x9f0   :  { %v2080_v32 = vsel %vm616_vm2, %v1860_v28, 0  ;;  %v2126_v33 = vsel %vm616_vm2, %v1861_v27, 0  ;;  %v3722_v34 = vunpack.i.h.bf16 %v3720_v29  ;;  %v3721_v35 = vunpack.i.l.bf16 %v3720_v29 }
 0x9f1   :  { %3514 = vmatpush3.bf16.xpose.msra.mxu1 %v2080_v32  ;;  %3520 = vmatpush3.bf16.xpose.msra.mxu0 %v2126_v33 }
 0x9f2   :  { %3525 = vmatprep.subr.bf16.mxu1 %v4275_v10  ;;  %3531 = vmatprep.subr.bf16.mxu0 %v4275_v10  ;;  %v1833_v38 = vpack.c.bf16 %v3722_v34, %v3722_v34  ;;  %v1832_v39 = vpack.c.bf16 %v3721_v35, %v3721_v35 }
 0x9f3   :  { %v3730_v42 = vpop.permute.xlu1 %3729 }
 0x9f4   :  { %v3732_v45 = vunpack.i.h.bf16 %v3730_v42  ;;  %v3731_v46 = vunpack.i.l.bf16 %v3730_v42 }
 0x9f6   :  { %v1835_v49 = vpack.c.bf16 %v3732_v45, %v3732_v45  ;;  %v1834_v50 = vpack.c.bf16 %v3731_v46, %v3731_v46 }
 0x9f8   :  { %3516 = vmatmul.mubr.msk.bf16.vlgmr.msra.gmra.mrb[52].mxu1 %vm616_vm2, %v1832_v39  ;;  %3522 = vmatmul.mubr.msk.bf16.vlgmr.msra.gmra.mrb[56].mxu0 %vm616_vm2, %v1833_v38 }
 0x9f9   :  { %3526 = vmatpush3.bf16.xpose.msra.mxu1 %v2172_v43  ;;  %3532 = vmatpush3.bf16.xpose.msra.mxu0 %v2218_v44 }
 0x9fa   :  { %3527 = vmatprep.mubr.msk.bf16.mxu1 %vm4276_vm1, %v4275_v10  ;;  %3533 = vmatprep.mubr.msk.bf16.mxu0 %vm4276_vm1, %v4275_v10 }
 0x9fb   :  { %3537 = vmatprep.subr.bf16.mxu1 %v4275_v10  ;;  %3543 = vmatprep.subr.bf16.mxu0 %v4275_v10 }
 0xa00   :  { %3528 = vmatmul.mubr.msk.bf16.vlgmr.msra.gmra.mrb[56].mxu1 %vm616_vm2, %v1834_v50  ;;  %3534 = vmatmul.mubr.msk.bf16.vlgmr.msra.gmra.mrb[60].mxu0 %vm616_vm2, %v1835_v49 }
 0xa01   :  { %3538 = vmatpush3.bf16.msra.mxu1 %v2368_v51  ;;  %3544 = vmatpush3.bf16.msra.mxu0 %v2414_v52 }
 0xa02   :  { %3539 = vmatprep.mubr.msk.bf16.mxu1 %vm4276_vm1, %v4275_v10  ;;  %3545 = vmatprep.mubr.msk.bf16.mxu0 %vm4276_vm1, %v4275_v10 }
 0xa03   :  { %3549 = vmatprep.subr.bf16.mxu1 %v4275_v10  ;;  %3555 = vmatprep.subr.bf16.mxu0 %v4275_v10 }
 0xa46   :  { %v1932_v53 = vpop.f32.mrb[44].mxu1 }
 0xa47   :  { %v2260_v54 = vmul.f32 0.35355338, %v1932_v53  ;;  %v3493_v55 = vpop.f32.mrb[45].mxu1 }
 0xa48   :  { %v1935_v56 = vpop.f32.mrb[46].mxu1  ;;  %v1978_v57 = vpop.f32.mrb[48].mxu0 }
 0xa49   :  { %v2261_v58 = vmul.f32 0.35355338, %v1978_v57  ;;  %v3494_v59 = vpop.f32.mrb[47].mxu1  ;;  %v3499_v60 = vpop.f32.mrb[49].mxu0  ;;  %v2268_v62 = vsel %vm616_vm2, %v2260_v54, -inf }
 0xa4a   :  { %2269 = vmax.xlane.f32.xlu0 %v2268_v62  ;;  %v1981_v63 = vpop.f32.mrb[50].mxu0 }
 0xa4b   :  { %v3500_v0 = vpop.f32.mrb[51].mxu0  ;;  %v2271_v2 = vsel %vm616_vm2, %v2261_v58, -inf }
 0xa4c   :  { %2272 = vmax.xlane.f32.xlu1 %v2271_v2 }
 0xabf   :  { %v2024_v3 = vpop.f32.mrb[48].mxu1  ;;  %v2070_v4 = vpop.f32.mrb[52].mxu0 }
 0xac0   :  { %v2262_v5 = vmul.f32 0.35355338, %v2024_v3  ;;  %v3505_v7 = vpop.f32.mrb[49].mxu1  ;;  %v3511_v8 = vpop.f32.mrb[53].mxu0  ;;  %v2263_v12 = vmul.f32 0.35355338, %v2070_v4 }
 0xac1   :  { %v2027_v9 = vpop.f32.mrb[50].mxu1  ;;  %v2073_v11 = vpop.f32.mrb[54].mxu0 }
 0xac2   :  { %v3506_v13 = vpop.f32.mrb[51].mxu1  ;;  %v3512_v14 = vpop.f32.mrb[55].mxu0  ;;  %v2274_v15 = vsel %vm616_vm2, %v2262_v5, -inf  ;;  %v2277_v16 = vsel %vm616_vm2, %v2263_v12, -inf }
 0xac3   :  { %2275 = vmax.xlane.f32.xlu0 %v2274_v15 }
 0xac7   :  { %2278 = vmax.xlane.f32.xlu0 %v2277_v16 }
 0xacb   :  { %v2116_v17 = vpop.f32.mrb[52].mxu1  ;;  %v2162_v18 = vpop.f32.mrb[56].mxu0 }
 0xacc   :  { %v2264_v19 = vmul.f32 0.35355338, %v2116_v17  ;;  %v2265_v20 = vmul.f32 0.35355338, %v2162_v18  ;;  %v3517_v21 = vpop.f32.mrb[53].mxu1  ;;  %v3523_v22 = vpop.f32.mrb[57].mxu0 }
 0xacd   :  { %v2119_v23 = vpop.f32.mrb[54].mxu1  ;;  %v2165_v24 = vpop.f32.mrb[58].mxu0 }
 0xace   :  { %v3518_v25 = vpop.f32.mrb[55].mxu1  ;;  %v3524_v26 = vpop.f32.mrb[59].mxu0  ;;  %v2280_v27 = vsel %vm616_vm2, %v2264_v19, -inf  ;;  %v2283_v28 = vsel %vm616_vm2, %v2265_v20, -inf }
 0xacf   :  { %2281 = vmax.xlane.f32.xlu0 %v2280_v27  ;;  %2284 = vmax.xlane.f32.xlu1 %v2283_v28 }
 0xad3   :  { %v2208_v29 = vpop.f32.mrb[56].mxu1  ;;  %v2254_v30 = vpop.f32.mrb[60].mxu0 }
 0xad4   :  { %v2266_v31 = vmul.f32 0.35355338, %v2208_v29  ;;  %v4961_v32 = vmul.f32 0.35355338, %v2254_v30  ;;  %v3529_v33 = vpop.f32.mrb[57].mxu1  ;;  %v3535_v34 = vpop.f32.mrb[61].mxu0 }
 0xad5   :  { %v2211_v35 = vpop.f32.mrb[58].mxu1  ;;  %v2257_v6 = vpop.f32.mrb[62].mxu0 }
 0xad6   :  { %v3530_v36 = vpop.f32.mrb[59].mxu1  ;;  %v3536_v37 = vpop.f32.mrb[63].mxu0  ;;  %v2286_v38 = vsel %vm616_vm2, %v2266_v31, -inf  ;;  %v2289_v39 = vsel %vm616_vm2, %v4961_v32, -inf }
 0xad7   :  { %v2270_v42 = vpop.xlane.xlu0 %2269  ;;  %2287 = vmax.xlane.f32.xlu0 %v2286_v38  ;;  %2290 = vmax.xlane.f32.xlu1 %v2289_v39 }
 0xad8   :  { %v2292_v43 = vsub.f32 %v2260_v54, %v2270_v42 }
 0xad9   :  { %v2273_v44 = vpop.xlane.xlu1 %2272 }
 0xada   :  { %v2300_v45 = vmul.f32 1.442695, %v2292_v43  ;;  %v2293_v46 = vsub.f32 %v2261_v58, %v2273_v44 }
 0xadc   :  { %3825 = vpow2.f32 %v2300_v45  ;;  %v2302_v47 = vmul.f32 1.442695, %v2293_v46 }
 0xade   :  { %3827 = vpow2.f32 %v2302_v47 }
 0xae6   :  { %v3826_v48 = vpop.eup %3825 }
 0xae7   :  { %v2316_v49 = vsel %vm616_vm2, %v3826_v48, 0.0 }
 0xae8   :  { %v3828_v50 = vpop.eup %3827  ;;  %2317 = vadd.xlane.f32.xlu0 %v2316_v49 }
 0xae9   :  { %v2319_v51 = vsel %vm616_vm2, %v3828_v50, 0.0 }
 0xaea   :  { %2320 = vadd.xlane.f32.xlu1 %v2319_v51 }
 0xb50   :  { %v2276_v52 = vpop.xlane.xlu0 %2275 }
 0xb51   :  { %v2294_v53 = vsub.f32 %v2262_v5, %v2276_v52 }
 0xb53   :  { %v2304_v55 = vmul.f32 1.442695, %v2294_v53 }
 0xb54   :  { %v2279_v56 = vpop.xlane.xlu0 %2278 }
 0xb55   :  { %3829 = vpow2.f32 %v2304_v55  ;;  %v2295_v54 = vsub.f32 %v2263_v12, %v2279_v56 }
 0xb57   :  { %v2306_v57 = vmul.f32 1.442695, %v2295_v54 }
 0xb59   :  { %3831 = vpow2.f32 %v2306_v57 }
 0xb5c   :  { %v2282_v58 = vpop.xlane.xlu0 %2281  ;;  %v2285_v59 = vpop.xlane.xlu1 %2284 }
 0xb5d   :  { %v2296_v60 = vsub.f32 %v2264_v19, %v2282_v58  ;;  %v2297_v62 = vsub.f32 %v2265_v20, %v2285_v59  ;;  %v3738_v20 = vpack.i.bf16 %v4929_v41, %v4927_v40 }
 0xb5f   :  { %v4968_v63 = vpop.eup %3829  ;;  %v2308_v0 = vmul.f32 1.442695, %v2296_v60  ;;  %v2310_v2 = vmul.f32 1.442695, %v2297_v62 }
 0xb60   :  { %v2322_v3 = vsel %vm616_vm2, %v4968_v63, 0.0 }
 0xb61   :  { %3833 = vpow2.f32 %v2308_v0  ;;  %2323 = vadd.xlane.f32.xlu0 %v2322_v3 }
 0xb62   :  { %3835 = vpow2.f32 %v2310_v2 }
 0xb63   :  { %v3832_v4 = vpop.eup %3831 }
 0xb64   :  { %v2288_v5 = vpop.xlane.xlu0 %2287  ;;  %v2325_v7 = vsel %vm616_vm2, %v3832_v4, 0.0  ;;  %v2291_v16 = vpop.xlane.xlu1 %2290 }
 0xb65   :  { %v2298_v8 = vsub.f32 %v2266_v31, %v2288_v5  ;;  %2326 = vadd.xlane.f32.xlu1 %v2325_v7  ;;  %v2299_v40 = vsub.f32 %v4961_v32, %v2291_v16 }
 0xb67   :  { %v2312_v9 = vmul.f32 1.442695, %v2298_v8  ;;  %v2314_v41 = vmul.f32 1.442695, %v2299_v40 }
 0xb69   :  { %3837 = vpow2.f32 %v2312_v9 }
 0xb6b   :  { %v4973_v11 = vpop.eup %3833 }
 0xb6c   :  { %v4975_v12 = vpop.eup %3835  ;;  %v2328_v13 = vsel %vm616_vm2, %v4973_v11, 0.0 }
 0xb6d   :  { %2329 = vadd.xlane.f32.xlu0 %v2328_v13  ;;  %v2331_v14 = vsel %vm616_vm2, %v4975_v12, 0.0 }
 0xb6e   :  { %2332 = vadd.xlane.f32.xlu1 %v2331_v14 }
 0xb73   :  { %v4981_v15 = vpop.eup %3837 }
 0xb74   :  { %v2334_v17 = vsel %vm616_vm2, %v4981_v15, 0.0 }
 0xb75   :  { %2335 = vadd.xlane.f32.xlu0 %v2334_v17  ;;  %v2318_v18 = vpop.xlane.xlu0 %2317 }
 0xb76   :  { %3839 = vrcp.f32 %v2318_v18 }
 0xb77   :  { %v2321_v19 = vpop.xlane.xlu1 %2320 }
 0xb78   :  { %3841 = vrcp.f32 %v2321_v19 }
 0xb79   :  { %3843 = vpow2.f32 %v2314_v41 }
 0xb7f   :  { %3739 = vrot.lane.b32.xlu1 %v3738_v20, %s4279_s15 }
 0xb80   :  { %v3840_v21 = vpop.eup %3839 }
 0xb81   :  { %v2348_v22 = vmul.f32 %v3840_v21, %v3826_v48 }
 0xb82   :  { %v3842_v23 = vpop.eup %3841 }
 0xb83   :  { %v2349_v24 = vmul.f32 %v3842_v23, %v3828_v50  ;;  %v2356_v25 = vpack.c.bf16 %v2348_v22, %v2348_v22  ;;  %v4996_v27 = vpop.eup %3843 }
 0xb84   :  { %v2337_v28 = vsel %vm616_vm2, %v4996_v27, 0.0 }
 0xb85   :  { %3540 = vmatmul.mubr.msk.bf16.vlgmr.msra.gmra.mrb[60].mxu1 %vm616_vm2, %v2356_v25  ;;  %v2357_v26 = vpack.c.bf16 %v2349_v24, %v2349_v24  ;;  %v3777_v25 = vld [vmem:[#allocation20] sm:$0xff]  }
 0xb86   :  { %3551 = vmatprep.mubr.msk.bf16.mxu1 %vm4276_vm1, %v4275_v10 }
 0xb87   :  { %3546 = vmatmul.mubr.msk.bf16.vlgmr.msra.gmra.mrb[64].mxu0 %vm616_vm2, %v2357_v26 }
 0xb88   :  { %3557 = vmatprep.mubr.msk.bf16.mxu0 %vm4276_vm1, %v4275_v10 }
 0xb8b   :  { %3734 = vrot.lane.b32.xlu0 %v3738_v20, %s4277_s16 }
 0xba3   :  { %2338 = vadd.xlane.f32.xlu1 %v2337_v28 }
 0xbb4   :  { %3744 = vrot.lane.b32.xlu1 %v3738_v20, %s4278_s12 }
 0xbee   :  { %v2324_v29 = vpop.xlane.xlu0 %2323 }
 0xbef   :  { %3845 = vrcp.f32 %v2324_v29 }
 0xbf2   :  { %v2327_v30 = vpop.xlane.xlu1 %2326 }
 0xbf3   :  { %3847 = vrcp.f32 %v2327_v30 }
 0xbf9   :  { %v3846_v35 = vpop.eup %3845 }
 0xbfa   :  { %v2330_v31 = vpop.xlane.xlu0 %2329  ;;  %v2350_v43 = vmul.f32 %v3846_v35, %v4968_v63 }
 0xbfb   :  { %v2333_v33 = vpop.xlane.xlu1 %2332  ;;  %3849 = vrcp.f32 %v2330_v31 }
 0xbfc   :  { %3851 = vrcp.f32 %v2333_v33  ;;  %v2358_v52 = vpack.c.bf16 %v2350_v43, %v2350_v43 }
 0xbfd   :  { %v3848_v6 = vpop.eup %3847 }
 0xbfe   :  { %v2351_v44 = vmul.f32 %v3848_v6, %v3832_v4 }
 0xbff   :  { %v3740_v32 = vpop.permute.xlu1 %3739 }
 0xc00   :  { %v3742_v37 = vunpack.i.h.bf16 %v3740_v32  ;;  %v3741_v38 = vunpack.i.l.bf16 %v3740_v32  ;;  %v2359_v53 = vpack.c.bf16 %v2351_v44, %v2351_v44 }
 0xc02   :  { %v2336_v34 = vpop.xlane.xlu0 %2335  ;;  %v1889_v47 = vpack.c.bf16 %v3742_v37, %v3742_v37  ;;  %v1888_v48 = vpack.c.bf16 %v3741_v38, %v3741_v38 }
 0xc03   :  { %3853 = vrcp.f32 %v2336_v34 }
 0xc04   :  { %v2552_v56 = vsel %vm1092_vm3, %v1888_v48, 0  ;;  %v2598_v54 = vsel %vm1092_vm3, %v1889_v47, 0 }
 0xc05   :  { %v3850_v51 = vpop.eup %3849 }
 0xc06   :  { %v3735_v36 = vpop.permute.xlu0 %3734  ;;  %v3852_v55 = vpop.eup %3851  ;;  %v2352_v57 = vmul.f32 %v3850_v51, %v4973_v11 }
 0xc07   :  { %v3737_v39 = vunpack.i.h.bf16 %v3735_v36  ;;  %v3736_v42 = vunpack.i.l.bf16 %v3735_v36  ;;  %v2353_v58 = vmul.f32 %v3852_v55, %v4975_v12 }
 0xc08   :  { %v2360_v59 = vpack.c.bf16 %v2352_v57, %v2352_v57 }
 0xc09   :  { %v1887_v45 = vpack.c.bf16 %v3737_v39, %v3737_v39  ;;  %v1886_v46 = vpack.c.bf16 %v3736_v42, %v3736_v42  ;;  %v2361_v60 = vpack.c.bf16 %v2353_v58, %v2353_v58  ;;  %v3778_v39 = vld [vmem:[#allocation20 + $0x8] sm:$0xff]  }
 0xc0b   :  { %v2460_v49 = vsel %vm1092_vm3, %v1886_v46, 0  ;;  %v2506_v50 = vsel %vm1092_vm3, %v1887_v45, 0 }
 0xc0c   :  { %3550 = vmatpush3.bf16.msra.mxu1 %v2460_v49  ;;  %3556 = vmatpush3.bf16.msra.mxu0 %v2506_v50 }
 0xc0d   :  { %3561 = vmatprep.subr.bf16.mxu1 %v4275_v10  ;;  %3567 = vmatprep.subr.bf16.mxu0 %v4275_v10  ;;  %v3854_v63 = vpop.eup %3853 }
 0xc0e   :  { %v2354_v4 = vmul.f32 %v3854_v63, %v4981_v15 }
 0xc0f   :  { %3552 = vmatmul.mubr.msk.bf16.vlgmr.msra.gmra.mrb[64].mxu1 %vm616_vm2, %v2358_v52  ;;  %3558 = vmatmul.mubr.msk.bf16.vlgmr.msra.gmra.mrb[68].mxu0 %vm616_vm2, %v2359_v53 }
 0xc10   :  { %3562 = vmatpush3.bf16.msra.mxu1 %v2552_v56  ;;  %3568 = vmatpush3.bf16.msra.mxu0 %v2598_v54  ;;  %v2362_v12 = vpack.c.bf16 %v2354_v4, %v2354_v4 }
 0xc11   :  { %3563 = vmatprep.mubr.msk.bf16.mxu1 %vm4276_vm1, %v4275_v10  ;;  %3569 = vmatprep.mubr.msk.bf16.mxu0 %vm4276_vm1, %v4275_v10 }
 0xc12   :  { %3573 = vmatprep.subr.bf16.mxu1 %v4275_v10  ;;  %3579 = vmatprep.subr.bf16.mxu0 %v4275_v10 }
 0xc17   :  { %3564 = vmatmul.mubr.msk.bf16.vlgmr.msra.gmra.mrb[68].mxu1 %vm616_vm2, %v2360_v59  ;;  %3570 = vmatmul.mubr.msk.bf16.vlgmr.msra.gmra.mrb[72].mxu0 %vm616_vm2, %v2361_v60 }
 0xc18   :  { %3575 = vmatprep.mubr.msk.bf16.mxu1 %vm4276_vm1, %v4275_v10  ;;  %3581 = vmatprep.mubr.msk.bf16.mxu0 %vm4276_vm1, %v4275_v10 }
 0xc30   :  { %v2339_v62 = vpop.xlane.xlu1 %2338 }
 0xc31   :  { %3855 = vrcp.f32 %v2339_v62 }
 0xc34   :  { %v3745_v0 = vpop.permute.xlu1 %3744 }
 0xc35   :  { %v3747_v2 = vunpack.i.h.bf16 %v3745_v0  ;;  %v3746_v3 = vunpack.i.l.bf16 %v3745_v0 }
 0xc37   :  { %v1891_v5 = vpack.c.bf16 %v3747_v2, %v3747_v2  ;;  %v1890_v7 = vpack.c.bf16 %v3746_v3, %v3746_v3 }
 0xc39   :  { %v2644_v8 = vsel %vm1092_vm3, %v1890_v7, 0  ;;  %v2690_v9 = vsel %vm1092_vm3, %v1891_v5, 0  ;;  %v3225_v5 = vld [vmem:[#allocation22] ss:$0 sm:$0xff] }
 0xc3a   :  { %3574 = vmatpush3.bf16.msra.mxu1 %v2644_v8  ;;  %3580 = vmatpush3.bf16.msra.mxu0 %v2690_v9 }
 0xc3b   :  { %v3856_v11 = vpop.eup %3855  ;;  %3585 = vmatprep.subr.bf16.mxu1 %v4275_v10  ;;  %3593 = vmatprep.subr.bf16.mxu0 %v4275_v10 }
 0xc3c   :  { %v2355_v13 = vmul.f32 %v3856_v11, %v4996_v27 }
 0xc3d   :  { %3576 = vmatmul.mubr.msk.bf16.vlgmr.msra.gmra.mrb[72].mxu1 %vm616_vm2, %v2362_v12 }
 0xc3e   :  { %v2363_v14 = vpack.c.bf16 %v2355_v13, %v2355_v13  ;;  %3589 = vmatprep.mubr.msk.bf16.mxu1 %vm4276_vm1, %v4275_v10  ;;  %3586 = vmatpush3.bf16.msra.mxu1 %v3777_v25 }
 0xc3f   :  { %3587 = vmatprep.subr.bf16.mxu1 %v4275_v10 }
 0xc40   :  { %3582 = vmatmul.mubr.msk.bf16.vlgmr.msra.gmra.mrb[76].mxu0 %vm616_vm2, %v2363_v14 }
 0xc41   :  { %3597 = vmatprep.mubr.msk.bf16.mxu0 %vm4276_vm1, %v4275_v10 }
 0xc42   :  { %3588 = vmatpush3.bf16.msra.mxu1 %v3778_v39 }
 0xc43   :  { %3601 = vmatprep.subr.bf16.mxu1 %v4275_v10 }
 0xc58   :  { %v2404_v15 = vpop.f32.mrb[60].mxu1 }
 0xc59   :  { %v3541_v16 = vpop.f32.mrb[61].mxu1 }
 0xc5a   :  { %v2407_v17 = vpop.f32.mrb[62].mxu1  ;;  %v2450_v18 = vpop.f32.mrb[64].mxu0 }
 0xc5b   :  { %v3542_v19 = vpop.f32.mrb[63].mxu1  ;;  %v3547_v20 = vpop.f32.mrb[65].mxu0 }
 0xc5c   :  { %v2453_v21 = vpop.f32.mrb[66].mxu0  ;;  %v3779_v20 = vld [vmem:[%s5149_s24] sm:$0xff]  }
 0xc5d   :  { %v3548_v22 = vpop.f32.mrb[67].mxu0  ;;  %3594 = vmatpush3.bf16.msra.mxu0 %v3779_v20  ;;  %v3780_v21 = vld [vmem:[%s5149_s24 + $0x8] sm:$0xff]  }
 0xc5e   :  { %3595 = vmatprep.subr.bf16.mxu0 %v4275_v10  ;;  %v3781_v22 = vld [vmem:[%s5151_s26] sm:$0xff]  }
 0xc61   :  { %3596 = vmatpush3.bf16.msra.mxu0 %v3780_v21 }
 0xce2   :  { %v2496_v23 = vpop.f32.mrb[64].mxu1  ;;  %v2542_v24 = vpop.f32.mrb[68].mxu0 }
 0xce3   :  { %v3748_v26 = vpack.i.bf16 %v2542_v24, %v2496_v23  ;;  %v3553_v40 = vpop.f32.mrb[65].mxu1  ;;  %v3559_v41 = vpop.f32.mrb[69].mxu0  ;;  %v3782_v23 = vld [vmem:[%s5151_s26 + $0x8] sm:$0xff]  }
 0xce4   :  { %v2499_v27 = vpop.f32.mrb[66].mxu1  ;;  %v2545_v28 = vpop.f32.mrb[70].mxu0 }
 0xce5   :  { %v3554_v29 = vpop.f32.mrb[67].mxu1  ;;  %3749 = vrot.lane.b32.xlu1 %v3748_v26, %s4280_s2  ;;  %v3560_v30 = vpop.f32.mrb[71].mxu0 }
 0xcea   :  { %v2588_v31 = vpop.f32.mrb[68].mxu1  ;;  %v2634_v33 = vpop.f32.mrb[72].mxu0 }
 0xceb   :  { %v3753_v34 = vpack.i.bf16 %v2634_v33, %v2588_v31  ;;  %v3565_v32 = vpop.f32.mrb[69].mxu1  ;;  %v3571_v35 = vpop.f32.mrb[73].mxu0 }
 0xcec   :  { %v2591_v6 = vpop.f32.mrb[70].mxu1  ;;  %v2637_v36 = vpop.f32.mrb[74].mxu0 }
 0xced   :  { %v3566_v37 = vpop.f32.mrb[71].mxu1  ;;  %3754 = vrot.lane.b32.xlu0 %v3753_v34, %s4281_s20  ;;  %v3572_v38 = vpop.f32.mrb[75].mxu0 }
 0xcee   :  { %v3229_v38 = vld [vmem:[#allocation23] ss:$0 sm:$0xff] }
 0xd10   :  { %v2680_v42 = vpop.f32.mrb[72].mxu1 }
 0xd11   :  { %v3577_v43 = vpop.f32.mrb[73].mxu1 }
 0xd12   :  { %v2683_v44 = vpop.f32.mrb[74].mxu1 }
 0xd13   :  { %v3578_v45 = vpop.f32.mrb[75].mxu1  ;;  %v2726_v46 = vpop.f32.mrb[76].mxu0 }
 0xd14   :  { %v3758_v47 = vpack.i.bf16 %v2726_v46, %v2680_v42  ;;  %v3583_v48 = vpop.f32.mrb[77].mxu0  ;;  %v3230_v45 = vld [vmem:[#allocation25] ss:$0 sm:$0xff] }
 0xd15   :  { %v2729_v49 = vpop.f32.mrb[78].mxu0 }
 0xd16   :  { %3759 = vrot.lane.b32.xlu1 %v3758_v47, %s4282_s3  ;;  %v3584_v50 = vpop.f32.mrb[79].mxu0 }
 0xd17   :  { %v3783_v50 = vld [vmem:[%s5151_s26 + $0x10] sm:$0xff]  }
 0xd57   :  { %v3750_v51 = vpop.permute.xlu1 %3749 }
 0xd58   :  { %v3752_v53 = vunpack.i.h.bf16 %v3750_v51  ;;  %v3751_v55 = vunpack.i.l.bf16 %v3750_v51  ;;  %v3784_v51 = vld [vmem:[%s5151_s26 + $0x18] sm:$0xff]   ;;  %s4283_s26 = smov 32  }
 0xd5a   :  { %v2757_v58 = vsel %vm616_vm2, %v2450_v18, %v3752_v53  ;;  %v2756_v59 = vsel %vm616_vm2, %v2404_v15, %v3751_v55 }
 0xd5f   :  { %v3755_v52 = vpop.permute.xlu0 %3754 }
 0xd60   :  { %v3757_v56 = vunpack.i.h.bf16 %v3755_v52  ;;  %v3756_v54 = vunpack.i.l.bf16 %v3755_v52  ;;  %v3231_v52 = vld [vmem:[#allocation26] ss:$0 sm:$0xff] }
 0xd62   :  { %v2759_v63 = vsel %vm1484_vm4, %v2757_v58, %v3757_v56  ;;  %v2758_v0 = vsel %vm1484_vm4, %v2756_v59, %v3756_v54 }
 0xd88   :  { %v3760_v57 = vpop.permute.xlu1 %3759 }
 0xd89   :  { %v3762_v60 = vunpack.i.h.bf16 %v3760_v57  ;;  %v3761_v62 = vunpack.i.l.bf16 %v3760_v57 }
 0xd8b   :  { %v2761_v2 = vsel %vm1487_vm5, %v2759_v63, %v3762_v60  ;;  %v2760_v3 = vsel %vm1487_vm5, %v2758_v0, %v3761_v62 }
 0xd8c   :  { %v2762_v4 = vpack.c.bf16 %v2761_v2, %v2760_v3 }
 0xd8e   :  { %3590 = vmatmul.mubr.msk.bf16.vlgmr.msra.gmra.mrb[76].mxu1 %vm288_vm0, %v2762_v4 }
 0xd8f   :  { %3609 = vmatprep.mubr.msk.bf16.mxu1 %vm4276_vm1, %v4275_v10  ;;  %3602 = vmatpush3.bf16.msra.mxu1 %v3781_v22 }
 0xd90   :  { %3603 = vmatprep.subr.bf16.mxu1 %v4275_v10 }
 0xd93   :  { %3604 = vmatpush3.bf16.msra.mxu1 %v3782_v23 }
 0xd94   :  { %3605 = vmatprep.subr.bf16.mxu1 %v4275_v10 }
 0xd97   :  { %3606 = vmatpush3.bf16.msra.mxu1 %v3783_v50 }
 0xd98   :  { %3607 = vmatprep.subr.bf16.mxu1 %v4275_v10  ;;  %v3235_v10 = vld [vmem:[%s5152_s27] ss:$0 sm:$0xff]  ;;  %s4284_s27 = smov 96  }
 0xd9b   :  { %3608 = vmatpush3.bf16.msra.mxu1 %v3784_v51 }
 0xe61   :  { %v2823_v7 = vpop.f32.mrb[76].mxu1 }
 0xe62   :  { %v2824_v8 = vadd.f32 %v3225_v5, %v2823_v7  ;;  %v3591_v9 = vpop.f32.mrb[77].mxu1 }
 0xe63   :  { %v2826_v11 = vpop.f32.mrb[78].mxu1 }
 0xe64   :  { %v5051_v12 = vadd.f32 %v2824_v8, %v4839_v61  ;;  %v2827_v13 = vadd.f32 %v3225_v5, %v2826_v11  ;;  %v3592_v14 = vpop.f32.mrb[79].mxu1 }
 0xe66   :  { %v5054_v15 = vadd.f32 %v2827_v13, %v4844_v1  ;;  %v2834_v16 = vsel %vm288_vm0, %v5051_v12, 0.0  ;;  %v2842_v17 = vmul.f32 %v5051_v12, %v5051_v12 }
 0xe67   :  { %2835 = vadd.xlane.f32.xlu0 %v2834_v16 }
 0xe68   :  { %v2837_v18 = vsel %vm288_vm0, %v5054_v15, 0.0  ;;  %v2844_v19 = vsel %vm288_vm0, %v2842_v17, 0.0  ;;  %v2843_v61 = vmul.f32 %v5054_v15, %v5054_v15 }
 0xe69   :  { %2838 = vadd.xlane.f32.xlu1 %v2837_v18 }
 0xe6a   :  { %v2847_v1 = vsel %vm288_vm0, %v2843_v61, 0.0 }
 0xe6b   :  { %2845 = vadd.xlane.f32.xlu0 %v2844_v19 }
 0xe6f   :  { %2848 = vadd.xlane.f32.xlu0 %v2847_v1 }
 0xef4   :  { %v2836_v24 = vpop.xlane.xlu0 %2835 }
 0xef5   :  { %v2840_v25 = vmul.f32 0.03125, %v2836_v24 }
 0xef6   :  { %v2839_v26 = vpop.xlane.xlu1 %2838 }
 0xef7   :  { %v2852_v41 = vmul.f32 %v2840_v25, %v2840_v25  ;;  %v2841_v27 = vmul.f32 0.03125, %v2839_v26  ;;  %v2856_v6 = vsub.f32 %v5051_v12, %v2840_v25 }
 0xef8   :  { %v2846_v40 = vpop.xlane.xlu0 %2845 }
 0xef9   :  { %v2850_v28 = vmul.f32 0.03125, %v2846_v40  ;;  %v2853_v31 = vmul.f32 %v2841_v27, %v2841_v27  ;;  %v2857_v39 = vsub.f32 %v5054_v15, %v2841_v27  ;;  %v4285_v40 = vmov 1966171168  }
 0xefa   :  { %v3113_v27 = vlaneseq }
 0xefb   :  { %v2854_v29 = vsub.f32 %v2850_v28, %v2852_v41  ;;  %v3111_v41 = vunpack.c.l.s4 %v4285_v40 }
 0xefc   :  { %v2849_v30 = vpop.xlane.xlu0 %2848  ;;  %vm3135_vm8 = vcmp.lt.s32.totalorder %v3113_v27, 512 }
 0xefd   :  { %v2858_v33 = vadd.f32 1e-05, %v2854_v29  ;;  %v2851_v34 = vmul.f32 0.03125, %v2849_v30 }
 0xeff   :  { %3857 = vrsqrt.f32 %v2858_v33  ;;  %v2855_v32 = vsub.f32 %v2851_v34, %v2853_v31 }
 0xf01   :  { %v2859_v35 = vadd.f32 1e-05, %v2855_v32 }
 0xf03   :  { %3859 = vrsqrt.f32 %v2859_v35  ;;  %v3112_v35 = vunpack.c.0.s8 %v3111_v41 }
 0xf09   :  { %v3858_v36 = vpop.eup %3857 }
 0xf0a   :  { %v2862_v37 = vmul.f32 %v3858_v36, %v2856_v6  ;;  %v3114_v6 = vshrl.u32 %v3113_v27, 7 }
 0xf0c   :  { %v2870_v44 = vmul.f32 %v3229_v38, %v2862_v37 }
 0xf0d   :  { %v3860_v42 = vpop.eup %3859 }
 0xf0e   :  { %v2863_v43 = vmul.f32 %v3860_v42, %v2857_v39  ;;  %v2878_v47 = vadd.f32 %v3230_v45, %v2870_v44 }
 0xf10   :  { %v2871_v46 = vmul.f32 %v3229_v38, %v2863_v43 }
 0xf12   :  { %v2879_v48 = vadd.f32 %v3230_v45, %v2871_v46  ;;  %v3115_v45 = vsub.s32 %v3112_v35, %v3114_v6 }
 0xf14   :  { %v2880_v49 = vpack.c.bf16 %v2879_v48, %v2878_v47 }
 0xf16   :  { %3598 = vmatmul.mubr.msk.bf16.vlgmr.msra.gmra.mrb[80].mxu0 %vm288_vm0, %v2880_v49 }
 0xfe9   :  { %v2941_v53 = vpop.f32.mrb[80].mxu0 }
 0xfea   :  { %v2942_v55 = vadd.f32 %v3231_v52, %v2941_v53  ;;  %v3599_v56 = vpop.f32.mrb[81].mxu0 }
 0xfeb   :  { %v2944_v54 = vpop.f32.mrb[82].mxu0 }
 0xfec   :  { %v2945_v57 = vadd.f32 %v3231_v52, %v2944_v54  ;;  %v3600_v58 = vpop.f32.mrb[83].mxu0  ;;  %v2948_v59 = vmax.f32 %v2942_v55, 0.0 }
 0xfee   :  { %v2949_v60 = vmax.f32 %v2945_v57, 0.0 }
 0xff0   :  { %v2950_v62 = vpack.c.bf16 %v2949_v60, %v2948_v59 }
 0xff2   :  { %3610 = vmatmul.mubr.msk.bf16.vlgmr.msra.gmra.mrb[80].mxu1 %vm2990_vm6, %v2950_v62 }
0x10c5   :  { %v3028_v63 = vpop.f32.mrb[80].mxu1 }
0x10c6   :  { %v3029_v0 = vadd.f32 %v3235_v10, %v3028_v63  ;;  %v3611_v2 = vpop.f32.mrb[81].mxu1 }
0x10c7   :  { %v3031_v3 = vpop.f32.mrb[82].mxu1 }
0x10c8   :  { %v3035_v4 = vadd.f32 %v3029_v0, %v5051_v12  ;;  %v3612_v5 = vpop.f32.mrb[83].mxu1  ;;  %v3032_v9 = vadd.f32 %v3235_v10, %v3031_v3 }
0x10ca   :  { %v3052_v7 = vrot.slane %v3035_v4, 5  ;;  %v3038_v8 = vrot.slane %v3035_v4, 1  ;;  %v3056_v11 = vrot.slane %v3035_v4, 6  ;;  %v3042_v13 = vrot.slane %v3035_v4, 2 }
0x10cb   :  { %v3036_v14 = vadd.f32 %v3032_v9, %v5054_v15  ;;  %v3060_v16 = vrot.slane %v3035_v4, 7  ;;  %v3046_v17 = vrot.slane %v3035_v4, 3  ;;  %v3050_v30 = vrot.slane %v3035_v4, 4 }
0x10cc   :  { %3053 = vrot.lane.b32.xlu1 %v3052_v7, %s4283_s26  ;;  %3039 = vrot.lane.b32.xlu0 %v3038_v8, %s4283_s26 }
0x10cd   :  { %v3069_v12 = vrot.slane %v3036_v14, 2  ;;  %v3065_v18 = vrot.slane %v3036_v14, 1  ;;  %v3073_v19 = vrot.slane %v3036_v14, 3  ;;  %v3079_v61 = vrot.slane %v3036_v14, 5 }
0x10ce   :  { %v3083_v1 = vrot.slane %v3036_v14, 6  ;;  %v3087_v20 = vrot.slane %v3036_v14, 7  ;;  %v3077_v42 = vrot.slane %v3036_v14, 4 }
0x10d0   :  { %3057 = vrot.lane.b32.xlu1 %v3056_v11, %s4264_s5  ;;  %3043 = vrot.lane.b32.xlu0 %v3042_v13, %s4264_s5 }
0x10d4   :  { %3061 = vrot.lane.b32.xlu1 %v3060_v16, %s4284_s27  ;;  %3047 = vrot.lane.b32.xlu0 %v3046_v17, %s4284_s27 }
0x10d8   :  { %3070 = vrot.lane.b32.xlu0 %v3069_v12, %s4264_s5  ;;  %3066 = vrot.lane.b32.xlu1 %v3065_v18, %s4283_s26 }
0x10dc   :  { %3074 = vrot.lane.b32.xlu0 %v3073_v19, %s4284_s27  ;;  %3080 = vrot.lane.b32.xlu1 %v3079_v61, %s4283_s26 }
0x10e0   :  { %3084 = vrot.lane.b32.xlu1 %v3083_v1, %s4264_s5  ;;  %s4286_s5 = smov [#allocation28]  }
0x10e1   :  { %s3144_s4 = sshll.u32 %s4286_s5, 4  ;;  %s3145_s4 = int_to_ptr.vmem [resolvable:$true] %s3144_s4 }
0x10e2   :  { %s4215_s22 = scalar_lea.vmem %s3145_s4, 64  ;;  %p4220_p3 = scmp.lt.s32.totalorder %s3145_s4, %s3145_s4 }
0x10e3   :  { %p4216_p2 = scmp.ne.s32.totalorder %s3145_s4, %s4215_s22  ;;  %p4221_p4 = scmp.lt.s32.totalorder %s4215_s22, %s4215_s22 }
0x10e4   :  { %3088 = vrot.lane.b32.xlu1 %v3087_v20, %s4284_s27 }
0x10e5   :  { %p4222_p5 = por %p4221_p4, %p4220_p3 }
0x10e7   :  { %p4223_p6 = pnand %p4222_p5, %p4216_p2 }
0x113e   :  { %v3054_v15 = vpop.permute.xlu1 %3053  ;;  %v3040_v21 = vpop.permute.xlu0 %3039 }
0x113f   :  { %v3095_v31 = vsel %vm288_vm0, %v3050_v30, %v3054_v15  ;;  %v3091_v33 = vsel %vm288_vm0, %v3035_v4, %v3040_v21 }
0x1142   :  { %v3058_v22 = vpop.permute.xlu1 %3057  ;;  %v3044_v23 = vpop.permute.xlu0 %3043 }
0x1143   :  { %v3096_v34 = vsel %vm2990_vm6, %v3095_v31, %v3058_v22  ;;  %v3092_v32 = vsel %vm2990_vm6, %v3091_v33, %v3044_v23 }
0x1146   :  { %v3062_v24 = vpop.permute.xlu1 %3061  ;;  %v3048_v25 = vpop.permute.xlu0 %3047 }
0x1147   :  { %v3097_v37 = vsel %vm3093_vm7, %v3096_v34, %v3062_v24  ;;  %v3094_v38 = vsel %vm3093_vm7, %v3092_v32, %v3048_v25 }
0x1148   :  { %v3108_v46 = vcombine.low %v3094_v38, %v3097_v37 }
0x114a   :  { %v3067_v26 = vpop.permute.xlu1 %3066  ;;  %v3071_v28 = vpop.permute.xlu0 %3070  ;;  %v3116_v53 = vrot.slane %v3108_v46, %v3115_v45 }
0x114b   :  { %v3098_v39 = vsel %vm288_vm0, %v3036_v14, %v3067_v26 }
0x114c   :  { %v3099_v47 = vsel %vm2990_vm6, %v3098_v39, %v3071_v28 }
0x114e   :  { %v3081_v29 = vpop.permute.xlu1 %3080  ;;  %v3075_v43 = vpop.permute.xlu0 %3074 }
0x114f   :  { %v3101_v44 = vsel %vm288_vm0, %v3077_v42, %v3081_v29  ;;  %v3100_v50 = vsel %vm3093_vm7, %v3099_v47, %v3075_v43 }
0x1152   :  { %v3085_v36 = vpop.permute.xlu1 %3084 }
0x1153   :  { %v3102_v48 = vsel %vm2990_vm6, %v3101_v44, %v3085_v36 }
0x1156   :  { %v3089_v49 = vpop.permute.xlu1 %3088 }
0x1157   :  { %v3103_v51 = vsel %vm3093_vm7, %v3102_v48, %v3089_v49 }
0x1158   :  { %v3109_v52 = vcombine.low %v3100_v50, %v3103_v51 }
0x115a   :  { %v3123_v55 = vrot.slane %v3109_v52, %v3115_v45 }
0x115c   :  { %v3124_v56 = vcombine.low %v3116_v53, %v3123_v55 }
0x115e   :  { %v3131_v54 = vrot.slane %v3124_v56, %v3115_v45 }
0x1160   :  { %3137 = vst.msk [vmem:[#allocation28] sm:$0xf] %vm3135_vm8, %v3131_v54 }
0x1161   :  { %4226 = shalt.err (!%p4223_p6)
}
0x1162   :  { %s5195_s11 = sld [smem:[#allocation52_spill]] }
0x1168   :  { %s4227_s0 = scalar_lea.hbm %s5195_s11, 64 }
0x1169   :  { %p4228_p7 = scmp.ne.s32.totalorder %s5195_s11, %s4227_s0  ;;  %p4231_p8 = scmp.lt.u32.totalorder %s4227_s0, %s5195_s11 }
0x116b   :  { %p4233_p9 = pnand %p4231_p8, %p4228_p7 }
0x116d   :  { %4236 = shalt.err (!%p4233_p9)
}
0x116e   :  { %3147 = dma.vmem_to_hbm [thread:$0]  %s3145_s4, 64, %s5195_s11, [#allocation4]  }
0x116f   :  { %4255 = dma.done.wait [#allocation4], 64  }
0x1170   :  { %4256 = vsyncadd [#allocation4], 4294967232 }
0x1171   :  { %3151 = vsyncpa [#allocation3], 1 }
0x1172   :  { %3152 = vsyncpa [#allocation6], 1 }
0x1173   :  { %3153 = vsyncpa [#allocation9], 1 }
0x1174   :  { %3154 = vsyncpa [#allocation12], 1 }
0x1175   :  { %3155 = vsyncpa [#allocation15], 1 }
0x1176   :  { %3156 = vsyncpa [#allocation18], 1 }
0x1177   :  { %3157 = vsyncpa [#allocation21], 1 }
0x1178   :  { %3158 = vsyncpa [#allocation24], 1 }
0x1179   :  { %3159 = vsyncpa [#allocation27], 1 }
0x117a   :  { %3160 = vsyncpa [#allocation4], 1 }

</bundles_post_ra>
